<compile_context>
chip_gen: v7x
topology: tpu7x:2x2x1
jax: 0.10.0
libtpu: 0.0.40
codegen_flags: <defaults>
</compile_context>

<pallas_src>
import functools

import jax
import jax.numpy as jnp
from jax import lax
from jax.experimental import pallas as pl
from jax.experimental.pallas import tpu as pltpu

_PAD = 8  # sublane-aligned conv carry (must be >= d_conv - 1 and a multiple of 8)


def _silu(v):
    return v * jax.nn.sigmoid(v)


def _softplus(v):
    return jnp.where(v > 20.0, v, jnp.log1p(jnp.exp(jnp.minimum(v, 20.0))))


# -----------------------------------------------------------------------------
# Pallas kernel: grid = (batch, seq-chunks); state carried in VMEM scratch.
# -----------------------------------------------------------------------------
def mamba2_block_kernel(u_ref, normw_ref, win_ref, convw_ref, convb_ref,
                        dtb_ref, alog_ref, dpar_ref, gnw_ref, wout_ref,
                        o_ref,
                        state_ref, convpad_ref, y_ref,
                        *, Q, d_ssm, d_state, ngroups, nheads, headdim,
                        d_conv, rms_eps, gate_eps):
    f32 = jnp.float32
    bf16 = jnp.bfloat16
    conv_dim = d_ssm + 2 * ngroups * d_state
    c = pl.program_id(1)

    # ---- reset carried state at the first chunk of every sequence ----
    @pl.when(c == 0)
    def _():
        state_ref[...] = jnp.zeros_like(state_ref)
        convpad_ref[...] = jnp.zeros_like(convpad_ref)

    u = u_ref[0].astype(f32)                                    # (Q, D)

    # ---- block-level RMSNorm (pre-norm) ----
    var = jnp.mean(u * u, axis=-1, keepdims=True)
    hidden = u * lax.rsqrt(var + rms_eps) * normw_ref[...]

    # ---- in_proj: bf16 operands, f32 accumulation (MXU) ----
    zxbcdt = jnp.dot(hidden.astype(bf16), win_ref[...],
                     preferred_element_type=f32)                # (Q, d_in_proj)
    z = zxbcdt[:, :d_ssm]
    xBC = zxbcdt[:, d_ssm:d_ssm + conv_dim]
    dt_raw = zxbcdt[:, d_ssm + conv_dim:]                       # (Q, nheads)

    # ---- causal depthwise conv1d via shifted reads (VPU only, no matmuls) ----
    # convpad rows [0:_PAD) hold the previous chunk's tail, [_PAD:_PAD+Q) this
    # chunk.  All scratch stores are 8-row aligned; the 4 tap reads are plain
    # value slices.
    convpad_ref[_PAD:_PAD + Q, :] = xBC
    padded = convpad_ref[...]                                   # (_PAD+Q, conv_dim)
    conv_w = convw_ref[...]                                     # (d_conv, conv_dim)
    acc = jnp.zeros((Q, conv_dim), f32)
    for k in range(d_conv):
        off = _PAD - (d_conv - 1) + k
        acc = acc + padded[off:off + Q, :] * conv_w[k:k + 1, :]
    xBC_act = _silu(acc + convb_ref[...])
    convpad_ref[0:_PAD, :] = xBC[Q - _PAD:, :]                  # carry for next chunk

    x_s = xBC_act[:, :d_ssm]
    B_s = xBC_act[:, d_ssm:d_ssm + ngroups * d_state]
    C_s = xBC_act[:, d_ssm + ngroups * d_state:]

    # ---- dt / A, intra-chunk inclusive cumsum of dt*A (tri is chunk-sized) ----
    dt = _softplus(dt_raw + dtb_ref[...])                       # (Q, nheads) >= 0
    A = -jnp.exp(alog_ref[...])                                 # (1, nheads) < 0
    a_mat = dt * A                                              # (Q, nheads) <= 0

    ii = lax.broadcasted_iota(jnp.int32, (Q, Q), 0)
    jj = lax.broadcasted_iota(jnp.int32, (Q, Q), 1)
    tri = (ii >= jj).astype(f32)                                # causal mask, built once
    cs = jnp.dot(tri, a_mat, preferred_element_type=f32)        # (Q, nheads), non-increasing

    csT = cs.T                                                  # (nheads, Q)
    dtT = dt.T                                                  # (nheads, Q)
    Dpar = dpar_ref[...]                                        # (1, nheads)
    cs_last = cs[Q - 1:Q, :]                                    # (1, nheads)

    heads_per_group = nheads // ngroups
    for g in range(ngroups):
        Bg = B_s[:, g * d_state:(g + 1) * d_state]              # (Q, d_state)
        Cg = C_s[:, g * d_state:(g + 1) * d_state]
        Bg16 = Bg.astype(bf16)
        Cg16 = Cg.astype(bf16)
        # group-shared inner products C_i . B_j, computed ONCE per group
        G = lax.dot_general(Cg16, Bg16, (((1,), (1,)), ((), ())),
                            preferred_element_type=f32)         # (Q, Q)
        for hh in range(heads_per_group):
            h = g * heads_per_group + hh
            cum_col = cs[:, h:h + 1]                            # (Q, 1)
            cum_row = csT[h:h + 1, :]                           # (1, Q)
            # exponent <= 0 on the causal region -> clamp, no -inf select
            decay = jnp.exp(jnp.minimum(cum_col - cum_row, 0.0)) * tri
            M = (G * decay * dtT[h:h + 1, :]).astype(bf16)      # (Q, Q)
            xh = x_s[:, h * headdim:(h + 1) * headdim]          # (Q, headdim)
            xh16 = xh.astype(bf16)

            # intra-chunk contribution
            yh = jnp.dot(M, xh16, preferred_element_type=f32)   # (Q, headdim)
            # inter-chunk contribution from the carried state
            S_prev = state_ref[h]                               # (headdim, d_state)
            y_state = lax.dot_general(Cg16, S_prev.astype(bf16),
                                      (((1,), (1,)), ((), ())),
                                      preferred_element_type=f32)
            yh = yh + jnp.exp(cum_col) * y_state + Dpar[:, h:h + 1] * xh
            # write this head's chunk output straight into the VMEM slab
            y_ref[:, h * headdim:(h + 1) * headdim] = yh

            # state update for the next chunk:
            #   S_new = exp(cs_last) * S_prev
            #         + sum_s exp(cs_last - cs_s) * dt_s * x_s (x) B_s
            w = jnp.exp(cs_last[:, h:h + 1] - cum_col) * dt[:, h:h + 1]   # (Q,1)
            xw16 = (xh * w).astype(bf16)
            S_inc = lax.dot_general(xw16, Bg16, (((0,), (0,)), ((), ())),
                                    preferred_element_type=f32)  # (headdim, d_state)
            state_ref[h] = jnp.exp(cs_last[:, h:h + 1]) * S_prev + S_inc

    # ---- gated RMSNorm: norm(y * silu(z)) * w  (norm_before_gate=False) ----
    y = y_ref[...]                                              # (Q, d_ssm)
    gated = y * _silu(z)
    gvar = jnp.mean(gated * gated, axis=-1, keepdims=True)
    y_norm = gated * lax.rsqrt(gvar + gate_eps) * gnw_ref[...]

    # ---- out_proj (bf16 x bf16 -> f32) + residual add ----
    out = jnp.dot(y_norm.astype(bf16), wout_ref[...],
                  preferred_element_type=f32)
    o_ref[0] = (out + u).astype(o_ref.dtype)


# -----------------------------------------------------------------------------
# Wrapper
# -----------------------------------------------------------------------------
def mamba2_block_v2(x, params, cfg, *, chunk=None):
    B, L, D = x.shape
    d_ssm, d_state = cfg["d_ssm"], cfg["d_state"]
    ngroups, nheads = cfg["ngroups"], cfg["nheads"]
    headdim, d_conv = cfg["headdim"], cfg["d_conv"]
    d_inner = cfg["d_inner"]
    assert d_ssm == d_inner, "slicing below assumes d_ssm == d_inner"
    conv_dim = d_ssm + 2 * ngroups * d_state
    d_in_proj = 2 * d_inner + 2 * ngroups * d_state + nheads

    Q = min(L, 128) if chunk is None else chunk
    assert L % Q == 0 and Q % 8 == 0 and Q >= _PAD
    assert d_conv - 1 <= _PAD
    n_chunks = L // Q

    kernel = functools.partial(
        mamba2_block_kernel,
        Q=Q, d_ssm=d_ssm, d_state=d_state, ngroups=ngroups, nheads=nheads,
        headdim=headdim, d_conv=d_conv,
        rms_eps=cfg["rms_eps"], gate_eps=cfg["gate_eps"])

    # projection weights stored/streamed in bf16, f32 accumulation in-kernel
    in_w = params["in_w"].astype(jnp.bfloat16)
    out_w = params["out_w"].astype(jnp.bfloat16)

    grid_spec = pltpu.PrefetchScalarGridSpec(
        num_scalar_prefetch=0,
        grid=(B, n_chunks),
        in_specs=[
            pl.BlockSpec((1, Q, D), lambda b, c: (b, c, 0)),          # x
            pl.BlockSpec((1, D), lambda b, c: (0, 0)),                # block norm w
            pl.BlockSpec((D, d_in_proj), lambda b, c: (0, 0)),        # in_proj W (bf16)
            pl.BlockSpec((d_conv, conv_dim), lambda b, c: (0, 0)),    # conv W
            pl.BlockSpec((1, conv_dim), lambda b, c: (0, 0)),         # conv b
            pl.BlockSpec((1, nheads), lambda b, c: (0, 0)),           # dt_bias
            pl.BlockSpec((1, nheads), lambda b, c: (0, 0)),           # A_log
            pl.BlockSpec((1, nheads), lambda b, c: (0, 0)),           # D
            pl.BlockSpec((1, d_ssm), lambda b, c: (0, 0)),            # gated norm w
            pl.BlockSpec((d_inner, D), lambda b, c: (0, 0)),          # out_proj W (bf16)
        ],
        out_specs=pl.BlockSpec((1, Q, D), lambda b, c: (b, c, 0)),
        scratch_shapes=[
            pltpu.VMEM((nheads, headdim, d_state), jnp.float32),   # carried SSM state
            pltpu.VMEM((_PAD + Q, conv_dim), jnp.float32),         # conv pad + tail carry
            pltpu.VMEM((Q, d_ssm), jnp.float32),                   # per-head output slab
        ],
    )

    return pl.pallas_call(
        kernel,
        out_shape=jax.ShapeDtypeStruct((B, L, D), x.dtype),
        grid_spec=grid_spec,
        compiler_params=pltpu.CompilerParams(
            dimension_semantics=("parallel", "arbitrary"),
            vmem_limit_bytes=32 * 1024 * 1024),
    )(x, params["norm_w"], in_w, params["conv_w"], params["conv_b"],
      params["dt_bias"], params["A_log"], params["D"], params["gn_w"], out_w)


# -----------------------------------------------------------------------------
# Deterministic parameter construction (shapes from Mamba2.__init__ defaults)
# -----------------------------------------------------------------------------
def make_config(d_model, d_state=64, d_conv=4, expand=2, headdim=64, ngroups=1,
                rmsnorm_eps=1e-5):
    d_inner = expand * d_model
    d_ssm = d_inner
    nheads = d_ssm // headdim
    assert d_ssm % headdim == 0
    return dict(d_model=d_model, d_state=d_state, d_conv=d_conv,
                d_inner=d_inner, d_ssm=d_ssm, nheads=nheads, headdim=headdim,
                ngroups=ngroups, rms_eps=rmsnorm_eps, gate_eps=1e-5)


def init_params(key, cfg, n_layer=1):
    D = cfg["d_model"]
    d_inner, d_ssm = cfg["d_inner"], cfg["d_ssm"]
    d_state, ngroups, nheads = cfg["d_state"], cfg["ngroups"], cfg["nheads"]
    d_conv = cfg["d_conv"]
    conv_dim = d_ssm + 2 * ngroups * d_state
    d_in_proj = 2 * d_inner + 2 * ngroups * d_state + nheads
    ks = jax.random.split(key, 6)

    in_w = jax.random.normal(ks[0], (D, d_in_proj), jnp.float32) * 0.02
    c = 1.0 / (d_conv ** 0.5)
    conv_w = jax.random.uniform(ks[1], (d_conv, conv_dim), jnp.float32, -c, c)
    conv_b = jax.random.uniform(ks[2], (1, conv_dim), jnp.float32, -0.1, 0.1)

    dt_min, dt_max, dt_floor = 1e-3, 0.1, 1e-4
    u = jax.random.uniform(ks[3], (1, nheads), jnp.float32)
    dt = jnp.exp(u * (jnp.log(dt_max) - jnp.log(dt_min)) + jnp.log(dt_min))
    dt = jnp.maximum(dt, dt_floor)
    dt_bias = dt + jnp.log(-jnp.expm1(-dt))          # inverse softplus

    A = jax.random.uniform(ks[4], (1, nheads), jnp.float32, 1.0, 16.0)
    A_log = jnp.log(A)
    D_par = jnp.ones((1, nheads), jnp.float32)

    norm_w = jnp.ones((1, D), jnp.float32)
    gn_w = jnp.ones((1, d_ssm), jnp.float32)
    out_w = (jax.random.normal(ks[5], (d_inner, D), jnp.float32) * 0.02
             / (n_layer ** 0.5))

    return dict(in_w=in_w, conv_w=conv_w, conv_b=conv_b, dt_bias=dt_bias,
                A_log=A_log, D=D_par, norm_w=norm_w, gn_w=gn_w, out_w=out_w)


# -----------------------------------------------------------------------------
# Pure-JAX reference (sequential SSM recurrence, all f32) for sanity checking
# -----------------------------------------------------------------------------
def mamba2_block_v2_ref(x, p, cfg):
    L = x.shape[1]
    d_ssm, d_state = cfg["d_ssm"], cfg["d_state"]
    ngroups, nheads = cfg["ngroups"], cfg["nheads"]
    headdim, d_conv = cfg["headdim"], cfg["d_conv"]
    conv_dim = d_ssm + 2 * ngroups * d_state
    h2g = jnp.arange(nheads) // (nheads // ngroups)

    def one(u):
        var = jnp.mean(u * u, -1, keepdims=True)
        hidden = u * lax.rsqrt(var + cfg["rms_eps"]) * p["norm_w"][0]
        zxbcdt = hidden @ p["in_w"]
        z = zxbcdt[:, :d_ssm]
        xBC = zxbcdt[:, d_ssm:d_ssm + conv_dim]
        dt_raw = zxbcdt[:, d_ssm + conv_dim:]
        padded = jnp.pad(xBC, ((d_conv - 1, 0), (0, 0)))
        conv = sum(padded[k:k + L] * p["conv_w"][k] for k in range(d_conv))
        xBC_act = _silu(conv + p["conv_b"][0])
        x_s = xBC_act[:, :d_ssm].reshape(L, nheads, headdim)
        B_s = xBC_act[:, d_ssm:d_ssm + ngroups * d_state].reshape(L, ngroups, d_state)
        C_s = xBC_act[:, d_ssm + ngroups * d_state:].reshape(L, ngroups, d_state)
        dt = jax.nn.softplus(dt_raw + p["dt_bias"][0])
        A = -jnp.exp(p["A_log"][0])
        Bh, Ch = B_s[:, h2g], C_s[:, h2g]

        def step(state, inp):
            dt_t, x_t, B_t, C_t = inp
            da = jnp.exp(dt_t * A)
            state = (da[:, None, None] * state
                     + (dt_t[:, None] * x_t)[:, :, None] * B_t[:, None, :])
            y_t = jnp.einsum("hpn,hn->hp", state, C_t) + p["D"][0][:, None] * x_t
            return state, y_t

        state0 = jnp.zeros((nheads, headdim, d_state), jnp.float32)
        _, ys = lax.scan(step, state0, (dt, x_s, Bh, Ch))
        y = ys.reshape(L, d_ssm)
        gated = y * _silu(z)
        gvar = jnp.mean(gated * gated, -1, keepdims=True)
        y_norm = gated * lax.rsqrt(gvar + cfg["gate_eps"]) * p["gn_w"][0]
        return y_norm @ p["out_w"] + u

    return jax.vmap(one)(x)


if __name__ == "__main__":
    # Small shapes: in_channels must be a multiple of 32 (headdim=64, expand=2).
    # L=32 with chunk=16 exercises the cross-chunk state + conv-tail carry.
    B, L, D = 2, 32, 64
    key = jax.random.PRNGKey(0)
    kx, kp = jax.random.split(key)
    x = jax.random.normal(kx, (B, L, D), jnp.float32)

    cfg = make_config(D, d_state=64, d_conv=4, expand=2)
    params = init_params(kp, cfg, n_layer=1)

    out = mamba2_block_v2(x, params, cfg, chunk=16)
    out = jax.block_until_ready(out)

    assert out.shape == (B, L, D) and out.dtype == jnp.float32
    assert bool(jnp.all(jnp.isfinite(out)))

    ref = jax.block_until_ready(mamba2_block_v2_ref(x, params, cfg))
    # kernel uses bf16 projection weights / matmul operands (f32 accumulation);
    # reference is pure f32, so allow bf16-level tolerance.
    err = float(jnp.max(jnp.abs(out - ref)))
    assert jnp.allclose(out, ref, rtol=3e-2, atol=1e-2), err

    print("KERNEL_OK")
</pallas_src>

<mosaic_0001>
module attributes {stable_mosaic.version = 11 : i64} {
  func.func @mamba2_block_kernel(%arg0: i32, %arg1: i32, %arg2: memref<1x16x64xf32, #tpu.memory_space<vmem>>, %arg3: memref<1x64xf32, #tpu.memory_space<vmem>>, %arg4: memref<64x386xbf16, #tpu.memory_space<vmem>>, %arg5: memref<4x256xf32, #tpu.memory_space<vmem>>, %arg6: memref<1x256xf32, #tpu.memory_space<vmem>>, %arg7: memref<1x2xf32, #tpu.memory_space<vmem>>, %arg8: memref<1x2xf32, #tpu.memory_space<vmem>>, %arg9: memref<1x2xf32, #tpu.memory_space<vmem>>, %arg10: memref<1x128xf32, #tpu.memory_space<vmem>>, %arg11: memref<128x64xbf16, #tpu.memory_space<vmem>>, %arg12: memref<1x16x64xf32, #tpu.memory_space<vmem>>, %arg13: memref<2x64x64xf32, #tpu.memory_space<vmem>>, %arg14: memref<24x256xf32, #tpu.memory_space<vmem>>, %arg15: memref<16x128xf32, #tpu.memory_space<vmem>>) attributes {dimension_semantics = [#tpu.dimension_semantics<parallel>, #tpu.dimension_semantics<arbitrary>], iteration_bounds = array<i64: 2, 2>, scalar_prefetch = 0 : i64, scratch_operands = 3 : i64, tpu.core_type = #tpu.core_type<tc>, window_params = [{transform_indices = @transform_0, window_bounds = array<i64: 1, 16, 64>}, {pipeline_mode = #tpu.pipeline_mode<synchronous>, transform_indices = @transform_1, window_bounds = array<i64: 1, 64>}, {pipeline_mode = #tpu.pipeline_mode<synchronous>, transform_indices = @transform_2, window_bounds = array<i64: 64, 386>}, {pipeline_mode = #tpu.pipeline_mode<synchronous>, transform_indices = @transform_3, window_bounds = array<i64: 4, 256>}, {pipeline_mode = #tpu.pipeline_mode<synchronous>, transform_indices = @transform_4, window_bounds = array<i64: 1, 256>}, {pipeline_mode = #tpu.pipeline_mode<synchronous>, transform_indices = @transform_5, window_bounds = array<i64: 1, 2>}, {pipeline_mode = #tpu.pipeline_mode<synchronous>, transform_indices = @transform_6, window_bounds = array<i64: 1, 2>}, {pipeline_mode = #tpu.pipeline_mode<synchronous>, transform_indices = @transform_7, window_bounds = array<i64: 1, 2>}, {pipeline_mode = #tpu.pipeline_mode<synchronous>, transform_indices = @transform_8, window_bounds = array<i64: 1, 128>}, {pipeline_mode = #tpu.pipeline_mode<synchronous>, transform_indices = @transform_9, window_bounds = array<i64: 128, 64>}, {transform_indices = @transform_10, window_bounds = array<i64: 1, 16, 64>}]} {
    %c0_i32 = arith.constant 0 : i32
    %0 = arith.cmpi eq, %arg1, %c0_i32 : i32
    %1 = arith.extui %0 : i1 to i32
    %c0_i32_0 = arith.constant 0 : i32
    %2 = arith.cmpi ne, %1, %c0_i32_0 : i32
    scf.if %2 {
      %cst_68 = arith.constant 0.000000e+00 : f32
      %215 = vector.broadcast %cst_68 : f32 to vector<2x64x64xf32>
      %c0_69 = arith.constant 0 : index
      %c0_70 = arith.constant 0 : index
      %c0_71 = arith.constant 0 : index
      %216 = vector.load %arg13[%c0_69, %c0_70, %c0_71] : memref<2x64x64xf32, #tpu.memory_space<vmem>>, vector<2x64x64xf32>
      tpu.vector_store %arg13[%c0_69, %c0_70, %c0_71], %215 {strides = array<i32>} : memref<2x64x64xf32, #tpu.memory_space<vmem>>, vector<2x64x64xf32>,
      %cst_72 = arith.constant 0.000000e+00 : f32
      %217 = vector.broadcast %cst_72 : f32 to vector<24x256xf32>
      %c0_73 = arith.constant 0 : index
      %c0_74 = arith.constant 0 : index
      %218 = vector.load %arg14[%c0_73, %c0_74] : memref<24x256xf32, #tpu.memory_space<vmem>>, vector<24x256xf32>
      tpu.vector_store %arg14[%c0_73, %c0_74], %217 {strides = array<i32>} : memref<24x256xf32, #tpu.memory_space<vmem>>, vector<24x256xf32>,
    } else {
    }
    %c0 = arith.constant 0 : index
    %c0_1 = arith.constant 0 : index
    %c0_2 = arith.constant 0 : index
    %3 = vector.load %arg2[%c0, %c0_1, %c0_2] : memref<1x16x64xf32, #tpu.memory_space<vmem>>, vector<1x16x64xf32>
    %4 = vector.shape_cast %3 : vector<1x16x64xf32> to vector<16x64xf32>
    %5 = arith.mulf %4, %4 : vector<16x64xf32>
    %cst = arith.constant dense<0.000000e+00> : vector<16xf32>
    %6 = vector.multi_reduction <add>, %5, %cst [1] : vector<16x64xf32> to vector<16xf32>
    %7 = vector.shape_cast %6 : vector<16xf32> to vector<16x1xf32>
    %cst_3 = arith.constant 6.400000e+01 : f32
    %8 = vector.broadcast %cst_3 : f32 to vector<16x1xf32>
    %9 = arith.divf %7, %8 : vector<16x1xf32>
    %cst_4 = arith.constant 9.99999974E-6 : f32
    %10 = vector.broadcast %cst_4 : f32 to vector<16x1xf32>
    %11 = arith.addf %9, %10 : vector<16x1xf32>
    %12 = math.rsqrt %11 : vector<16x1xf32>
    %13 = vector.broadcast %12 : vector<16x1xf32> to vector<16x64xf32>
    %14 = arith.mulf %4, %13 : vector<16x64xf32>
    %c0_5 = arith.constant 0 : index
    %c0_6 = arith.constant 0 : index
    %15 = vector.load %arg3[%c0_5, %c0_6] : memref<1x64xf32, #tpu.memory_space<vmem>>, vector<1x64xf32>
    %16 = vector.broadcast %15 : vector<1x64xf32> to vector<16x64xf32>
    %17 = arith.mulf %14, %16 : vector<16x64xf32>
    %18 = arith.truncf %17 : vector<16x64xf32> to vector<16x64xbf16>
    %c0_7 = arith.constant 0 : index
    %c0_8 = arith.constant 0 : index
    %19 = vector.load %arg4[%c0_7, %c0_8] : memref<64x386xbf16, #tpu.memory_space<vmem>>, vector<64x386xbf16>
    %cst_9 = arith.constant dense<0.000000e+00> : vector<16x386xf32>
    %20 = tpu.matmul %18, %19, %cst_9 {dimension_numbers = #tpu.dot_dimension_numbers<[1], [0], [0], [1], [0, 0, 1, 1], [], []>} : vector<16x64xbf16>, vector<64x386xbf16>, vector<16x386xf32> -> vector<16x386xf32>
    %21 = vector.extract_strided_slice %20 {offsets = [0, 0], sizes = [16, 128], strides = [1, 1]} : vector<16x386xf32> to vector<16x128xf32>
    %22 = vector.extract_strided_slice %20 {offsets = [0, 128], sizes = [16, 256], strides = [1, 1]} : vector<16x386xf32> to vector<16x256xf32>
    %23 = vector.extract_strided_slice %20 {offsets = [0, 384], sizes = [16, 2], strides = [1, 1]} : vector<16x386xf32> to vector<16x2xf32>
    %c8 = arith.constant 8 : index
    %c0_10 = arith.constant 0 : index
    %24 = vector.load %arg14[%c8, %c0_10] : memref<24x256xf32, #tpu.memory_space<vmem>>, vector<16x256xf32>
    tpu.vector_store %arg14[%c8, %c0_10], %22 {strides = array<i32>} : memref<24x256xf32, #tpu.memory_space<vmem>>, vector<16x256xf32>,
    %c0_11 = arith.constant 0 : index
    %c0_12 = arith.constant 0 : index
    %25 = vector.load %arg14[%c0_11, %c0_12] : memref<24x256xf32, #tpu.memory_space<vmem>>, vector<24x256xf32>
    %c0_13 = arith.constant 0 : index
    %c0_14 = arith.constant 0 : index
    %26 = vector.load %arg5[%c0_13, %c0_14] : memref<4x256xf32, #tpu.memory_space<vmem>>, vector<4x256xf32>
    %cst_15 = arith.constant 0.000000e+00 : f32
    %27 = vector.broadcast %cst_15 : f32 to vector<16x256xf32>
    %28 = vector.extract_strided_slice %25 {offsets = [5, 0], sizes = [16, 256], strides = [1, 1]} : vector<24x256xf32> to vector<16x256xf32>
    %29 = vector.extract_strided_slice %26 {offsets = [0, 0], sizes = [1, 256], strides = [1, 1]} : vector<4x256xf32> to vector<1x256xf32>
    %30 = vector.broadcast %29 : vector<1x256xf32> to vector<16x256xf32>
    %31 = arith.mulf %28, %30 : vector<16x256xf32>
    %32 = arith.addf %27, %31 : vector<16x256xf32>
    %33 = vector.extract_strided_slice %25 {offsets = [6, 0], sizes = [16, 256], strides = [1, 1]} : vector<24x256xf32> to vector<16x256xf32>
    %34 = vector.extract_strided_slice %26 {offsets = [1, 0], sizes = [1, 256], strides = [1, 1]} : vector<4x256xf32> to vector<1x256xf32>
    %35 = vector.broadcast %34 : vector<1x256xf32> to vector<16x256xf32>
    %36 = arith.mulf %33, %35 : vector<16x256xf32>
    %37 = arith.addf %32, %36 : vector<16x256xf32>
    %38 = vector.extract_strided_slice %25 {offsets = [7, 0], sizes = [16, 256], strides = [1, 1]} : vector<24x256xf32> to vector<16x256xf32>
    %39 = vector.extract_strided_slice %26 {offsets = [2, 0], sizes = [1, 256], strides = [1, 1]} : vector<4x256xf32> to vector<1x256xf32>
    %40 = vector.broadcast %39 : vector<1x256xf32> to vector<16x256xf32>
    %41 = arith.mulf %38, %40 : vector<16x256xf32>
    %42 = arith.addf %37, %41 : vector<16x256xf32>
    %43 = vector.extract_strided_slice %25 {offsets = [8, 0], sizes = [16, 256], strides = [1, 1]} : vector<24x256xf32> to vector<16x256xf32>
    %44 = vector.extract_strided_slice %26 {offsets = [3, 0], sizes = [1, 256], strides = [1, 1]} : vector<4x256xf32> to vector<1x256xf32>
    %45 = vector.broadcast %44 : vector<1x256xf32> to vector<16x256xf32>
    %46 = arith.mulf %43, %45 : vector<16x256xf32>
    %47 = arith.addf %42, %46 : vector<16x256xf32>
    %c0_16 = arith.constant 0 : index
    %c0_17 = arith.constant 0 : index
    %48 = vector.load %arg6[%c0_16, %c0_17] : memref<1x256xf32, #tpu.memory_space<vmem>>, vector<1x256xf32>
    %49 = vector.broadcast %48 : vector<1x256xf32> to vector<16x256xf32>
    %50 = arith.addf %47, %49 : vector<16x256xf32>
    %51 = arith.negf %50 : vector<16x256xf32>
    %52 = math.exp %51 : vector<16x256xf32>
    %cst_18 = arith.constant 1.000000e+00 : f32
    %53 = vector.broadcast %cst_18 : f32 to vector<16x256xf32>
    %54 = arith.addf %53, %52 : vector<16x256xf32>
    %55 = arith.divf %53, %54 : vector<16x256xf32>
    %56 = arith.mulf %50, %55 : vector<16x256xf32>
    %57 = vector.extract_strided_slice %22 {offsets = [8, 0], sizes = [8, 256], strides = [1, 1]} : vector<16x256xf32> to vector<8x256xf32>
    %c0_19 = arith.constant 0 : index
    %c0_20 = arith.constant 0 : index
    %58 = vector.load %arg14[%c0_19, %c0_20] : memref<24x256xf32, #tpu.memory_space<vmem>>, vector<8x256xf32>
    tpu.vector_store %arg14[%c0_19, %c0_20], %57 {strides = array<i32>} : memref<24x256xf32, #tpu.memory_space<vmem>>, vector<8x256xf32>,
    %59 = vector.extract_strided_slice %56 {offsets = [0, 0], sizes = [16, 128], strides = [1, 1]} : vector<16x256xf32> to vector<16x128xf32>
    %60 = vector.extract_strided_slice %56 {offsets = [0, 128], sizes = [16, 64], strides = [1, 1]} : vector<16x256xf32> to vector<16x64xf32>
    %61 = vector.extract_strided_slice %56 {offsets = [0, 192], sizes = [16, 64], strides = [1, 1]} : vector<16x256xf32> to vector<16x64xf32>
    %c0_21 = arith.constant 0 : index
    %c0_22 = arith.constant 0 : index
    %62 = vector.load %arg7[%c0_21, %c0_22] : memref<1x2xf32, #tpu.memory_space<vmem>>, vector<1x2xf32>
    %63 = vector.broadcast %62 : vector<1x2xf32> to vector<16x2xf32>
    %64 = arith.addf %23, %63 : vector<16x2xf32>
    %cst_23 = arith.constant 2.000000e+01 : f32
    %65 = vector.broadcast %cst_23 : f32 to vector<16x2xf32>
    %66 = arith.cmpf ogt, %64, %65 : vector<16x2xf32>
    %cst_24 = arith.constant 2.000000e+01 : f32
    %67 = vector.broadcast %cst_24 : f32 to vector<16x2xf32>
    %68 = arith.minimumf %64, %67 : vector<16x2xf32>
    %69 = math.exp %68 : vector<16x2xf32>
    %70 = math.log1p %69 : vector<16x2xf32>
    %71 = arith.select %66, %64, %70 : vector<16x2xi1>, vector<16x2xf32>
    %c0_25 = arith.constant 0 : index
    %c0_26 = arith.constant 0 : index
    %72 = vector.load %arg8[%c0_25, %c0_26] : memref<1x2xf32, #tpu.memory_space<vmem>>, vector<1x2xf32>
    %73 = math.exp %72 : vector<1x2xf32>
    %cst_27 = arith.constant 0.000000e+00 : f32
    %74 = vector.broadcast %cst_27 : f32 to vector<1x2xf32>
    %75 = arith.subf %74, %73 : vector<1x2xf32>
    %76 = vector.broadcast %75 : vector<1x2xf32> to vector<16x2xf32>
    %77 = arith.mulf %71, %76 : vector<16x2xf32>
    %78 = tpu.iota {dimensions = array<i32: 0>} : vector<16x16xi32>
    %79 = tpu.iota {dimensions = array<i32: 1>} : vector<16x16xi32>
    %80 = arith.cmpi sge, %78, %79 : vector<16x16xi32>
    %81 = arith.extui %80 : vector<16x16xi1> to vector<16x16xi32>
    %82 = arith.sitofp %81 : vector<16x16xi32> to vector<16x16xf32>
    %cst_28 = arith.constant dense<0.000000e+00> : vector<16x2xf32>
    %83 = tpu.matmul %82, %77, %cst_28 {dimension_numbers = #tpu.dot_dimension_numbers<[1], [0], [0], [1], [0, 0, 1, 1], [], []>} : vector<16x16xf32>, vector<16x2xf32>, vector<16x2xf32> -> vector<16x2xf32>
    %84 = tpu.transpose %83, [1, 0] : vector<16x2xf32> -> vector<2x16xf32>
    %85 = tpu.transpose %71, [1, 0] : vector<16x2xf32> -> vector<2x16xf32>
    %c0_29 = arith.constant 0 : index
    %c0_30 = arith.constant 0 : index
    %86 = vector.load %arg9[%c0_29, %c0_30] : memref<1x2xf32, #tpu.memory_space<vmem>>, vector<1x2xf32>
    %87 = vector.extract_strided_slice %83 {offsets = [15, 0], sizes = [1, 2], strides = [1, 1]} : vector<16x2xf32> to vector<1x2xf32>
    %88 = arith.truncf %60 : vector<16x64xf32> to vector<16x64xbf16>
    %89 = arith.truncf %61 : vector<16x64xf32> to vector<16x64xbf16>
    %cst_31 = arith.constant dense<0.000000e+00> : vector<16x16xf32>
    %90 = tpu.matmul %89, %88, %cst_31 {dimension_numbers = #tpu.dot_dimension_numbers<[1], [1], [0], [0], [0, 0, 1, 0], [], []>} : vector<16x64xbf16>, vector<16x64xbf16>, vector<16x16xf32> -> vector<16x16xf32>
    %91 = vector.extract_strided_slice %83 {offsets = [0, 0], sizes = [16, 1], strides = [1, 1]} : vector<16x2xf32> to vector<16x1xf32>
    %92 = vector.extract_strided_slice %84 {offsets = [0, 0], sizes = [1, 16], strides = [1, 1]} : vector<2x16xf32> to vector<1x16xf32>
    %93 = vector.broadcast %91 : vector<16x1xf32> to vector<16x16xf32>
    %94 = vector.broadcast %92 : vector<1x16xf32> to vector<16x16xf32>
    %95 = arith.subf %93, %94 : vector<16x16xf32>
    %cst_32 = arith.constant 0.000000e+00 : f32
    %96 = vector.broadcast %cst_32 : f32 to vector<16x16xf32>
    %97 = arith.minimumf %95, %96 : vector<16x16xf32>
    %98 = math.exp %97 : vector<16x16xf32>
    %99 = arith.mulf %98, %82 : vector<16x16xf32>
    %100 = arith.mulf %90, %99 : vector<16x16xf32>
    %101 = vector.extract_strided_slice %85 {offsets = [0, 0], sizes = [1, 16], strides = [1, 1]} : vector<2x16xf32> to vector<1x16xf32>
    %102 = vector.broadcast %101 : vector<1x16xf32> to vector<16x16xf32>
    %103 = arith.mulf %100, %102 : vector<16x16xf32>
    %104 = arith.truncf %103 : vector<16x16xf32> to vector<16x16xbf16>
    %105 = vector.extract_strided_slice %59 {offsets = [0, 0], sizes = [16, 64], strides = [1, 1]} : vector<16x128xf32> to vector<16x64xf32>
    %106 = arith.truncf %105 : vector<16x64xf32> to vector<16x64xbf16>
    %cst_33 = arith.constant dense<0.000000e+00> : vector<16x64xf32>
    %107 = tpu.matmul %104, %106, %cst_33 {dimension_numbers = #tpu.dot_dimension_numbers<[1], [0], [0], [1], [0, 0, 1, 1], [], []>} : vector<16x16xbf16>, vector<16x64xbf16>, vector<16x64xf32> -> vector<16x64xf32>
    %c0_34 = arith.constant 0 : index
    %c0_35 = arith.constant 0 : index
    %c0_36 = arith.constant 0 : index
    %108 = vector.load %arg13[%c0_34, %c0_35, %c0_36] : memref<2x64x64xf32, #tpu.memory_space<vmem>>, vector<1x64x64xf32>
    %109 = vector.shape_cast %108 : vector<1x64x64xf32> to vector<64x64xf32>
    %110 = arith.truncf %109 : vector<64x64xf32> to vector<64x64xbf16>
    %cst_37 = arith.constant dense<0.000000e+00> : vector<16x64xf32>
    %111 = tpu.matmul %89, %110, %cst_37 {dimension_numbers = #tpu.dot_dimension_numbers<[1], [1], [0], [0], [0, 0, 1, 0], [], []>} : vector<16x64xbf16>, vector<64x64xbf16>, vector<16x64xf32> -> vector<16x64xf32>
    %112 = math.exp %91 : vector<16x1xf32>
    %113 = vector.broadcast %112 : vector<16x1xf32> to vector<16x64xf32>
    %114 = arith.mulf %113, %111 : vector<16x64xf32>
    %115 = arith.addf %107, %114 : vector<16x64xf32>
    %116 = vector.extract_strided_slice %86 {offsets = [0, 0], sizes = [1, 1], strides = [1, 1]} : vector<1x2xf32> to vector<1x1xf32>
    %117 = vector.broadcast %116 : vector<1x1xf32> to vector<16x64xf32>
    %118 = arith.mulf %117, %105 : vector<16x64xf32>
    %119 = arith.addf %115, %118 : vector<16x64xf32>
    %c0_38 = arith.constant 0 : index
    %c0_39 = arith.constant 0 : index
    %120 = vector.load %arg15[%c0_38, %c0_39] : memref<16x128xf32, #tpu.memory_space<vmem>>, vector<16x64xf32>
    tpu.vector_store %arg15[%c0_38, %c0_39], %119 {strides = array<i32>} : memref<16x128xf32, #tpu.memory_space<vmem>>, vector<16x64xf32>,
    %121 = vector.extract_strided_slice %87 {offsets = [0, 0], sizes = [1, 1], strides = [1, 1]} : vector<1x2xf32> to vector<1x1xf32>
    %122 = vector.broadcast %121 : vector<1x1xf32> to vector<16x1xf32>
    %123 = arith.subf %122, %91 : vector<16x1xf32>
    %124 = math.exp %123 : vector<16x1xf32>
    %125 = vector.extract_strided_slice %71 {offsets = [0, 0], sizes = [16, 1], strides = [1, 1]} : vector<16x2xf32> to vector<16x1xf32>
    %126 = arith.mulf %124, %125 : vector<16x1xf32>
    %127 = vector.broadcast %126 : vector<16x1xf32> to vector<16x64xf32>
    %128 = arith.mulf %105, %127 : vector<16x64xf32>
    %129 = arith.truncf %128 : vector<16x64xf32> to vector<16x64xbf16>
    %cst_40 = arith.constant dense<0.000000e+00> : vector<64x64xf32>
    %130 = tpu.matmul %129, %88, %cst_40 {dimension_numbers = #tpu.dot_dimension_numbers<[0], [0], [1], [1], [0, 1, 1, 1], [], []>} : vector<16x64xbf16>, vector<16x64xbf16>, vector<64x64xf32> -> vector<64x64xf32>
    %131 = vector.extract_strided_slice %87 {offsets = [0, 0], sizes = [1, 1], strides = [1, 1]} : vector<1x2xf32> to vector<1x1xf32>
    %132 = math.exp %131 : vector<1x1xf32>
    %133 = vector.broadcast %132 : vector<1x1xf32> to vector<64x64xf32>
    %134 = arith.mulf %133, %109 : vector<64x64xf32>
    %135 = arith.addf %134, %130 : vector<64x64xf32>
    %c0_41 = arith.constant 0 : index
    %c0_42 = arith.constant 0 : index
    %c0_43 = arith.constant 0 : index
    %136 = vector.load %arg13[%c0_41, %c0_42, %c0_43] : memref<2x64x64xf32, #tpu.memory_space<vmem>>, vector<1x64x64xf32>
    %137 = vector.shape_cast %136 : vector<1x64x64xf32> to vector<64x64xf32>
    %138 = vector.shape_cast %135 : vector<64x64xf32> to vector<1x64x64xf32>
    tpu.vector_store %arg13[%c0_41, %c0_42, %c0_43], %138 {strides = array<i32>} : memref<2x64x64xf32, #tpu.memory_space<vmem>>, vector<1x64x64xf32>,
    %139 = vector.extract_strided_slice %83 {offsets = [0, 1], sizes = [16, 1], strides = [1, 1]} : vector<16x2xf32> to vector<16x1xf32>
    %140 = vector.extract_strided_slice %84 {offsets = [1, 0], sizes = [1, 16], strides = [1, 1]} : vector<2x16xf32> to vector<1x16xf32>
    %141 = vector.broadcast %139 : vector<16x1xf32> to vector<16x16xf32>
    %142 = vector.broadcast %140 : vector<1x16xf32> to vector<16x16xf32>
    %143 = arith.subf %141, %142 : vector<16x16xf32>
    %cst_44 = arith.constant 0.000000e+00 : f32
    %144 = vector.broadcast %cst_44 : f32 to vector<16x16xf32>
    %145 = arith.minimumf %143, %144 : vector<16x16xf32>
    %146 = math.exp %145 : vector<16x16xf32>
    %147 = arith.mulf %146, %82 : vector<16x16xf32>
    %148 = arith.mulf %90, %147 : vector<16x16xf32>
    %149 = vector.extract_strided_slice %85 {offsets = [1, 0], sizes = [1, 16], strides = [1, 1]} : vector<2x16xf32> to vector<1x16xf32>
    %150 = vector.broadcast %149 : vector<1x16xf32> to vector<16x16xf32>
    %151 = arith.mulf %148, %150 : vector<16x16xf32>
    %152 = arith.truncf %151 : vector<16x16xf32> to vector<16x16xbf16>
    %153 = vector.extract_strided_slice %59 {offsets = [0, 64], sizes = [16, 64], strides = [1, 1]} : vector<16x128xf32> to vector<16x64xf32>
    %154 = arith.truncf %153 : vector<16x64xf32> to vector<16x64xbf16>
    %cst_45 = arith.constant dense<0.000000e+00> : vector<16x64xf32>
    %155 = tpu.matmul %152, %154, %cst_45 {dimension_numbers = #tpu.dot_dimension_numbers<[1], [0], [0], [1], [0, 0, 1, 1], [], []>} : vector<16x16xbf16>, vector<16x64xbf16>, vector<16x64xf32> -> vector<16x64xf32>
    %c1 = arith.constant 1 : index
    %c0_46 = arith.constant 0 : index
    %c0_47 = arith.constant 0 : index
    %156 = vector.load %arg13[%c1, %c0_46, %c0_47] : memref<2x64x64xf32, #tpu.memory_space<vmem>>, vector<1x64x64xf32>
    %157 = vector.shape_cast %156 : vector<1x64x64xf32> to vector<64x64xf32>
    %158 = arith.truncf %157 : vector<64x64xf32> to vector<64x64xbf16>
    %cst_48 = arith.constant dense<0.000000e+00> : vector<16x64xf32>
    %159 = tpu.matmul %89, %158, %cst_48 {dimension_numbers = #tpu.dot_dimension_numbers<[1], [1], [0], [0], [0, 0, 1, 0], [], []>} : vector<16x64xbf16>, vector<64x64xbf16>, vector<16x64xf32> -> vector<16x64xf32>
    %160 = math.exp %139 : vector<16x1xf32>
    %161 = vector.broadcast %160 : vector<16x1xf32> to vector<16x64xf32>
    %162 = arith.mulf %161, %159 : vector<16x64xf32>
    %163 = arith.addf %155, %162 : vector<16x64xf32>
    %164 = vector.extract_strided_slice %86 {offsets = [0, 1], sizes = [1, 1], strides = [1, 1]} : vector<1x2xf32> to vector<1x1xf32>
    %165 = vector.broadcast %164 : vector<1x1xf32> to vector<16x64xf32>
    %166 = arith.mulf %165, %153 : vector<16x64xf32>
    %167 = arith.addf %163, %166 : vector<16x64xf32>
    %c0_49 = arith.constant 0 : index
    %c64 = arith.constant 64 : index
    %168 = vector.load %arg15[%c0_49, %c64] : memref<16x128xf32, #tpu.memory_space<vmem>>, vector<16x64xf32>
    tpu.vector_store %arg15[%c0_49, %c64], %167 {strides = array<i32>} : memref<16x128xf32, #tpu.memory_space<vmem>>, vector<16x64xf32>,
    %169 = vector.extract_strided_slice %87 {offsets = [0, 1], sizes = [1, 1], strides = [1, 1]} : vector<1x2xf32> to vector<1x1xf32>
    %170 = vector.broadcast %169 : vector<1x1xf32> to vector<16x1xf32>
    %171 = arith.subf %170, %139 : vector<16x1xf32>
    %172 = math.exp %171 : vector<16x1xf32>
    %173 = vector.extract_strided_slice %71 {offsets = [0, 1], sizes = [16, 1], strides = [1, 1]} : vector<16x2xf32> to vector<16x1xf32>
    %174 = arith.mulf %172, %173 : vector<16x1xf32>
    %175 = vector.broadcast %174 : vector<16x1xf32> to vector<16x64xf32>
    %176 = arith.mulf %153, %175 : vector<16x64xf32>
    %177 = arith.truncf %176 : vector<16x64xf32> to vector<16x64xbf16>
    %cst_50 = arith.constant dense<0.000000e+00> : vector<64x64xf32>
    %178 = tpu.matmul %177, %88, %cst_50 {dimension_numbers = #tpu.dot_dimension_numbers<[0], [0], [1], [1], [0, 1, 1, 1], [], []>} : vector<16x64xbf16>, vector<16x64xbf16>, vector<64x64xf32> -> vector<64x64xf32>
    %179 = vector.extract_strided_slice %87 {offsets = [0, 1], sizes = [1, 1], strides = [1, 1]} : vector<1x2xf32> to vector<1x1xf32>
    %180 = math.exp %179 : vector<1x1xf32>
    %181 = vector.broadcast %180 : vector<1x1xf32> to vector<64x64xf32>
    %182 = arith.mulf %181, %157 : vector<64x64xf32>
    %183 = arith.addf %182, %178 : vector<64x64xf32>
    %c1_51 = arith.constant 1 : index
    %c0_52 = arith.constant 0 : index
    %c0_53 = arith.constant 0 : index
    %184 = vector.load %arg13[%c1_51, %c0_52, %c0_53] : memref<2x64x64xf32, #tpu.memory_space<vmem>>, vector<1x64x64xf32>
    %185 = vector.shape_cast %184 : vector<1x64x64xf32> to vector<64x64xf32>
    %186 = vector.shape_cast %183 : vector<64x64xf32> to vector<1x64x64xf32>
    tpu.vector_store %arg13[%c1_51, %c0_52, %c0_53], %186 {strides = array<i32>} : memref<2x64x64xf32, #tpu.memory_space<vmem>>, vector<1x64x64xf32>,
    %c0_54 = arith.constant 0 : index
    %c0_55 = arith.constant 0 : index
    %187 = vector.load %arg15[%c0_54, %c0_55] : memref<16x128xf32, #tpu.memory_space<vmem>>, vector<16x128xf32>
    %188 = arith.negf %21 : vector<16x128xf32>
    %189 = math.exp %188 : vector<16x128xf32>
    %cst_56 = arith.constant 1.000000e+00 : f32
    %190 = vector.broadcast %cst_56 : f32 to vector<16x128xf32>
    %191 = arith.addf %190, %189 : vector<16x128xf32>
    %192 = arith.divf %190, %191 : vector<16x128xf32>
    %193 = arith.mulf %21, %192 : vector<16x128xf32>
    %194 = arith.mulf %187, %193 : vector<16x128xf32>
    %195 = arith.mulf %194, %194 : vector<16x128xf32>
    %cst_57 = arith.constant dense<0.000000e+00> : vector<16xf32>
    %196 = vector.multi_reduction <add>, %195, %cst_57 [1] : vector<16x128xf32> to vector<16xf32>
    %197 = vector.shape_cast %196 : vector<16xf32> to vector<16x1xf32>
    %cst_58 = arith.constant 1.280000e+02 : f32
    %198 = vector.broadcast %cst_58 : f32 to vector<16x1xf32>
    %199 = arith.divf %197, %198 : vector<16x1xf32>
    %cst_59 = arith.constant 9.99999974E-6 : f32
    %200 = vector.broadcast %cst_59 : f32 to vector<16x1xf32>
    %201 = arith.addf %199, %200 : vector<16x1xf32>
    %202 = math.rsqrt %201 : vector<16x1xf32>
    %203 = vector.broadcast %202 : vector<16x1xf32> to vector<16x128xf32>
    %204 = arith.mulf %194, %203 : vector<16x128xf32>
    %c0_60 = arith.constant 0 : index
    %c0_61 = arith.constant 0 : index
    %205 = vector.load %arg10[%c0_60, %c0_61] : memref<1x128xf32, #tpu.memory_space<vmem>>, vector<1x128xf32>
    %206 = vector.broadcast %205 : vector<1x128xf32> to vector<16x128xf32>
    %207 = arith.mulf %204, %206 : vector<16x128xf32>
    %208 = arith.truncf %207 : vector<16x128xf32> to vector<16x128xbf16>
    %c0_62 = arith.constant 0 : index
    %c0_63 = arith.constant 0 : index
    %209 = vector.load %arg11[%c0_62, %c0_63] : memref<128x64xbf16, #tpu.memory_space<vmem>>, vector<128x64xbf16>
    %cst_64 = arith.constant dense<0.000000e+00> : vector<16x64xf32>
    %210 = tpu.matmul %208, %209, %cst_64 {dimension_numbers = #tpu.dot_dimension_numbers<[1], [0], [0], [1], [0, 0, 1, 1], [], []>} : vector<16x128xbf16>, vector<128x64xbf16>, vector<16x64xf32> -> vector<16x64xf32>
    %211 = arith.addf %210, %4 : vector<16x64xf32>
    %c0_65 = arith.constant 0 : index
    %c0_66 = arith.constant 0 : index
    %c0_67 = arith.constant 0 : index
    %212 = vector.load %arg12[%c0_65, %c0_66, %c0_67] : memref<1x16x64xf32, #tpu.memory_space<vmem>>, vector<1x16x64xf32>
    %213 = vector.shape_cast %212 : vector<1x16x64xf32> to vector<16x64xf32>
    %214 = vector.shape_cast %211 : vector<16x64xf32> to vector<1x16x64xf32>
    tpu.vector_store %arg12[%c0_65, %c0_66, %c0_67], %214 {strides = array<i32>} : memref<1x16x64xf32, #tpu.memory_space<vmem>>, vector<1x16x64xf32>,
    return
  }
  func.func @transform_0(%arg0: i32, %arg1: i32) -> (i32, i32, i32) {
    %c0_i32 = arith.constant 0 : i32
    %c0_i32_0 = arith.constant 0 : i32
    return %arg0, %arg1, %c0_i32 : i32, i32, i32
  }
  func.func @transform_1(%arg0: i32, %arg1: i32) -> (i32, i32) {
    %c0_i32 = arith.constant 0 : i32
    %c0_i32_0 = arith.constant 0 : i32
    %c0_i32_1 = arith.constant 0 : i32
    return %c0_i32, %c0_i32_0 : i32, i32
  }
  func.func @transform_2(%arg0: i32, %arg1: i32) -> (i32, i32) {
    %c0_i32 = arith.constant 0 : i32
    %c0_i32_0 = arith.constant 0 : i32
    %c0_i32_1 = arith.constant 0 : i32
    return %c0_i32, %c0_i32_0 : i32, i32
  }
  func.func @transform_3(%arg0: i32, %arg1: i32) -> (i32, i32) {
    %c0_i32 = arith.constant 0 : i32
    %c0_i32_0 = arith.constant 0 : i32
    %c0_i32_1 = arith.constant 0 : i32
    return %c0_i32, %c0_i32_0 : i32, i32
  }
  func.func @transform_4(%arg0: i32, %arg1: i32) -> (i32, i32) {
    %c0_i32 = arith.constant 0 : i32
    %c0_i32_0 = arith.constant 0 : i32
    %c0_i32_1 = arith.constant 0 : i32
    return %c0_i32, %c0_i32_0 : i32, i32
  }
  func.func @transform_5(%arg0: i32, %arg1: i32) -> (i32, i32) {
    %c0_i32 = arith.constant 0 : i32
    %c0_i32_0 = arith.constant 0 : i32
    %c0_i32_1 = arith.constant 0 : i32
    return %c0_i32, %c0_i32_0 : i32, i32
  }
  func.func @transform_6(%arg0: i32, %arg1: i32) -> (i32, i32) {
    %c0_i32 = arith.constant 0 : i32
    %c0_i32_0 = arith.constant 0 : i32
    %c0_i32_1 = arith.constant 0 : i32
    return %c0_i32, %c0_i32_0 : i32, i32
  }
  func.func @transform_7(%arg0: i32, %arg1: i32) -> (i32, i32) {
    %c0_i32 = arith.constant 0 : i32
    %c0_i32_0 = arith.constant 0 : i32
    %c0_i32_1 = arith.constant 0 : i32
    return %c0_i32, %c0_i32_0 : i32, i32
  }
  func.func @transform_8(%arg0: i32, %arg1: i32) -> (i32, i32) {
    %c0_i32 = arith.constant 0 : i32
    %c0_i32_0 = arith.constant 0 : i32
    %c0_i32_1 = arith.constant 0 : i32
    return %c0_i32, %c0_i32_0 : i32, i32
  }
  func.func @transform_9(%arg0: i32, %arg1: i32) -> (i32, i32) {
    %c0_i32 = arith.constant 0 : i32
    %c0_i32_0 = arith.constant 0 : i32
    %c0_i32_1 = arith.constant 0 : i32
    return %c0_i32, %c0_i32_0 : i32, i32
  }
  func.func @transform_10(%arg0: i32, %arg1: i32) -> (i32, i32, i32) {
    %c0_i32 = arith.constant 0 : i32
    %c0_i32_0 = arith.constant 0 : i32
    return %arg0, %arg1, %c0_i32 : i32, i32, i32
  }
}

</mosaic_0001>

<bundles_post_ra>
// kernel: tpu_custom_call.1
= control target key start
LH: loop header
LB: loop body
LE: loop exit
PB: predicated region body
PF: predicated region fallthrough
CT: control target
= control target key end

     0   :  { %15 = vsyncpa [#allocation6], 0  ;;  %s3395_s0 = inlined_call_operand.vmem [shape: f32[2,32,64], index: 0, kind: input, shape index: {}]   ;;  %s3396_s1 = inlined_call_operand.vmem [shape: f32[1,64], index: 1, kind: input, shape index: {}]   ;;  %s3397_s2 = inlined_call_operand.hbm [shape: bf16[64,386], index: 2, kind: input, shape index: {}]   ;;  %s3398_s3 = inlined_call_operand.vmem [shape: f32[4,256], index: 3, kind: input, shape index: {}]   ;;  %s3399_s4 = inlined_call_operand.vmem [shape: f32[1,256], index: 4, kind: input, shape index: {}]   ;;  %s3400_s5 = inlined_call_operand.vmem [shape: f32[1,2], index: 5, kind: input, shape index: {}]   ;;  %s3401_s6 = inlined_call_operand.vmem [shape: f32[1,2], index: 6, kind: input, shape index: {}]   ;;  %s3402_s7 = inlined_call_operand.vmem [shape: f32[1,2], index: 7, kind: input, shape index: {}]   ;;  %s3403_s8 = inlined_call_operand.vmem [shape: f32[1,128], index: 8, kind: input, shape index: {}]   ;;  %s3404_s9 = inlined_call_operand.vmem [shape: bf16[128,64], index: 9, kind: input, shape index: {}]   ;;  %s3405_s10 = inlined_call_operand.hbm [shape: f32[2,32,64], index: 10, kind: output, shape index: {}]  }
   0x1   :  { %16 = vsyncpa [#allocation7], 0 }
   0x2   :  { %18 = vsyncpa [#allocation7 + $0x1], 0  ;;  %s2766_s13 = smov 0   ;;  %s2768_s14 = smov 0  }
   0x3   :  { %s2770_s15 = smov 0   ;;  %s2772_s16 = smov 0  }
   0x4   :  { %s2774_s17 = smov 0   ;;  %s2776_s18 = smov 0  }
   0x5   :  { %s2778_s19 = smov 0   ;;  %s2780_s20 = smov 0  }
   0x6 LB: > { %3414 = sst [smem:[#allocation11_spill]] %s2688_s18  ;;  %s2161_s21 = sadd.s32 4294967295, %s2696_s20   ;;  %s2696_s20 = sphi %s2780_s20, %s24_s20   ;;  %s2692_s19 = sphi %s2778_s19, %s3436_s19   ;;  %s2688_s18 = sphi %s2776_s18, %s3431_s18   ;;  %s2684_s17 = sphi %s2774_s17, %s3430_s17   ;;  %s2680_s16 = sphi %s2772_s16, %s3429_s16   ;;  %s2676_s15 = sphi %s2770_s15, %s3435_s15   ;;  %s2672_s14 = sphi %s2768_s14, %s3434_s14   ;;  %s2668_s13 = sphi %s2766_s13, %s3433_s13  }
   0x7   : > { %3415 = sst [smem:[#allocation12_spill]] %s2692_s19  ;;  %s2162_s22 = sadd.s32 4294967294, %s2696_s20  }
   0x8   : > { %s33_s23 = sadd.s32 1, %s2688_s18  ;;  %s36_s24 = sadd.s32 1, %s2692_s19 }
   0x9   : > { %p34_p0 = scmp.ge.s32.totalorder %s33_s23, 2  ;;  %s262_s25 = sadd.s32 1, %s2676_s15 }
   0xa   : > { %p272_p1 = scmp.ne.s32.totalorder %s2676_s15, %s2672_s14  ;;  %p273_p2 = scmp.eq.s32.totalorder %s2161_s21, 3 }
   0xb   : > { %s3438_s23 = smov (%p34_p0, %s33_s23), 0  ;;  %s3440_s24 = smov (!%p34_p0, %s36_s24), %s2692_s19 }
   0xc   : > { %3416 = sst [smem:[#allocation13_spill]] %s3438_s23  ;;  %s258_s26 = ssub.s32 %s2688_s18, %s3438_s23 }
   0xd   : > { %p2818_p3 = por %p273_p2, %p272_p1  ;;  %p38_p4 = scmp.ge.s32.totalorder %s3440_s24, 2 }
   0xe   : > { %p278_p5 = scmp.ne.s32.totalorder %s2672_s14, %s2668_s13  ;;  %p279_p6 = scmp.eq.s32.totalorder %s2162_s22, 3 }
   0xf   : > { %s3417_s27 = scalar_select %p2818_p3, 1, 0 }
  0x10   : > { %p2163_p7 = scmp.ge.s32.totalorder %s2696_s20, 1  ;;  %s3442_s24 = smov (%p38_p4, %s3440_s24), 0 }
  0x11   : > { %3418 = sst [smem:[#allocation14_spill]] %s3442_s24  ;;  %p2827_p8 = por %p279_p6, %p278_p5 }
  0x12   : > { %p286_p9 = scmp.lt.s32.totalorder %s2696_s20, 5  ;;  %s257_s29 = ssub.s32 %s2692_s19, %s3442_s24 }
  0x13   : > { %s3419_s28 = scalar_select %p2827_p8, 1, 0 }
  0x14   : > { %s259_s30 = sor.u32 %s258_s26, %s257_s29  ;;  %p2834_p10 = pnand %p2163_p7, %p286_p9 }
  0x15   : > { %p260_p11 = scmp.eq.s32.totalorder %s259_s30, 0  ;;  %p2838_p12 = scmp.eq.s32.totalorder %s2161_s21, 0 }
  0x16   : > { %s3420_s11 = scalar_select %p2834_p10, 1, 0 }
  0x17   : > { %s3421_s12 = scalar_select %p2838_p12, 1, 0 }
  0x18   : > { %p2376_p13 = pneg %p2834_p10  ;;  %s2698_s23 = smov [#allocation5]  }
  0x19   : > { %s2845_s22 = scalar_select %p260_p11, %s2676_s15, %s262_s25  }
  0x1a   : > { %s301_s18 = sshll.u32 %s2698_s23, 4  ;;  %p2849_p0 = pnand %p2838_p12, %p2376_p13  ;;  %s302_s18 = int_to_ptr.vmem [resolvable:$true] %s301_s18 }
  0x1b   : > { %3422 = sst [smem:[#allocation15_spill]] %s2845_s22  ;;  %s2570_s21 = scalar_lea.hbm %s3397_s2, 2048 }
  0x1c   : > { %p2571_p1 = scmp.ne.s32.totalorder %s3397_s2, %s2570_s21  ;;  %p2572_p2 = pneg %p2849_p0 }
  0x1d   : > { %p2577_p6 = scmp.lt.u32.totalorder %s2570_s21, %s3397_s2 }
  0x1e   : > { %p2573_p4 = pnand %p2572_p2, %p2571_p1 }
  0x20   : > { %p2574_p5 = pneg %p2573_p4 }
  0x22   : > { %p2579_p7 = pnand %p2577_p6, %p2574_p5 }
  0x24   : > { %2582 = shalt.err (!%p2579_p7)
}
  0x25   : > { %s2583_s22 = scalar_lea.vmem %s302_s18, 2048  ;;  %p2591_p8 = scmp.lt.s32.totalorder %s302_s18, %s302_s18 }
  0x26   : > { %p2584_p9 = scmp.ne.s32.totalorder %s302_s18, %s2583_s22  ;;  %p2592_p3 = scmp.lt.s32.totalorder %s2583_s22, %s2583_s22 }
  0x28   : > { %p2586_p11 = pnand %p2584_p9, %p2572_p2  ;;  %p2593_p12 = por %p2592_p3, %p2591_p8 }
  0x2a   : > { %p2587_p13 = pneg %p2586_p11 }
  0x2c   : > { %p2594_p10 = pnand %p2593_p12, %p2587_p13 }
  0x2e   : > { %2597 = shalt.err (!%p2594_p10)
}
  0x2f   : > { %s2699_s19 = smov 256   ;;  %s2700_s24 = smov 16  }
  0x30   : > { %2379 = dma.hbm_to_vmem [thread:$0]  (!%p2849_p0), %s3397_s2, 2048, %s302_s18, [#allocation6], %s2699_s19, %s2699_s19, %s2700_s24  }
  0x31   : > { %p3424_p1 = scmp.ne.s32.totalorder %s3420_s11, 0 }
  0x32   : > { %p3425_p4 = scmp.ne.s32.totalorder (!%p3424_p1), %s3421_s12, 0 }
  0x33   : > { %351 = sbr.rel (%p3424_p1) target bundleno = 1795 (0x703), region = 60 }
  0x3a   : > { %2659 = dma.done.wait (%p3425_p4), [#allocation6], 2048  }
  0x3b   : > { %2661 = vsyncadd (%p3425_p4), [#allocation6], 4294965248  ;;  %s390_s22 = sand.u32 1, %s2672_s14   ;;  %s2877_s26 = sshll.u32 %s2680_s16, 1 }
  0x3c   : > { %s2168_s18 = sshll.u32 %s390_s22, 4  ;;  %p394_p3 = scmp.lt.s32.totalorder %s2684_s17, 1 }
  0x3d   : > { %p396_p8 = scmp.lt.s32.totalorder %s2877_s26, 3  ;;  %s2890_s30 = scalar_lea.vmem [#allocation8], %s2168_s18 }
  0x3e   : > { %s395_s11 = scalar_select %p394_p3, %s2684_s17, 1 }
  0x3f   : > { %s397_s21 = scalar_select %p396_p8, %s2877_s26, 3 }
  0x40   : > { %s2170_s23 = sshll.u32 %s395_s11, 2  ;;  %p2172_p10 = scmp.ne.s32.totalorder %s2680_s16, 0 }
  0x41   : > { %s399_s25 = sadd.s32 %s2170_s23, %s397_s21  ;;  %vm409_vm0 = vcmask (!%p2172_p10), 523264   ;;  %v2701_v0 = vmov (!%p2172_p10), 0.0  }
  0x42   : > { %s2171_s12 = sshll.u32 %s399_s25, 3  ;;  %408 = sbr.rel (%p2172_p10) target bundleno = 75 (0x4b), region = 68  ;;  %410 = vst.msk [vmem:[#allocation2] sm:$0xff] (!%p2172_p10), %vm409_vm0, %v2701_v0  ;;  %411 = vst.msk [vmem:[#allocation2 + $0x8] sm:$0xff] (!%p2172_p10), %vm409_vm0, %v2701_v0 }
  0x43   : > { %s2888_s29 = scalar_lea.vmem %s3395_s0, %s2171_s12  ;;  %412 = vst.msk [vmem:[#allocation2 + $0x10] sm:$0xff] (!%p2172_p10), %vm409_vm0, %v2701_v0  ;;  %413 = vst.msk [vmem:[#allocation2 + $0x18] sm:$0xff] (!%p2172_p10), %vm409_vm0, %v2701_v0 }
  0x44   : > { %414 = vst.msk [vmem:[#allocation2 + $0x20] sm:$0xff] (!%p2172_p10), %vm409_vm0, %v2701_v0  ;;  %415 = vst.msk [vmem:[#allocation2 + $0x28] sm:$0xff] (!%p2172_p10), %vm409_vm0, %v2701_v0 }
  0x45   : > { %416 = vst.msk [vmem:[#allocation2 + $0x30] sm:$0xff] (!%p2172_p10), %vm409_vm0, %v2701_v0  ;;  %417 = vst.msk [vmem:[#allocation2 + $0x38] sm:$0xff] (!%p2172_p10), %vm409_vm0, %v2701_v0 }
  0x46   : > { %418 = vst.msk [vmem:[#allocation2 + $0x40] sm:$0xff] (!%p2172_p10), %vm409_vm0, %v2701_v0  ;;  %419 = vst.msk [vmem:[#allocation2 + $0x48] sm:$0xff] (!%p2172_p10), %vm409_vm0, %v2701_v0 }
  0x47   : > { %420 = vst.msk [vmem:[#allocation2 + $0x50] sm:$0xff] (!%p2172_p10), %vm409_vm0, %v2701_v0  ;;  %421 = vst.msk [vmem:[#allocation2 + $0x58] sm:$0xff] (!%p2172_p10), %vm409_vm0, %v2701_v0 }
  0x48   : > { %422 = vst.msk [vmem:[#allocation2 + $0x60] sm:$0xff] (!%p2172_p10), %vm409_vm0, %v2701_v0  ;;  %423 = vst.msk [vmem:[#allocation2 + $0x68] sm:$0xff] (!%p2172_p10), %vm409_vm0, %v2701_v0 }
  0x49   : > { %424 = vst.msk [vmem:[#allocation2 + $0x70] sm:$0xff] %vm409_vm0, %v2701_v0  ;;  %425 = vst.msk [vmem:[#allocation2 + $0x78] sm:$0xff] %vm409_vm0, %v2701_v0 }
  0x4a   : > { %426 = vst [vmem:[#allocation3] sm:$0xff] %v2701_v0  ;;  %427 = vst [vmem:[#allocation3 + $0x8] sm:$0xff] %v2701_v0 }
  0x4b PF: > { %v432_v1 = vld [vmem:[%s2888_s29] sm:$0xff]  ;;  %vm436_vm1 = vcmask 523264   ;;  %v433_v2 = vld [vmem:[%s2888_s29 + $0x8] sm:$0xff]  ;;  %v2702_v12 = vmov 0   ;;  %v659_v38 = vlaneseq  ;;  %vm962_vm3 = vcmask 130048   ;;  %s2705_s18 = smov 64  }
  0x4c   : > { %v434_v3 = vmul.f32 %v432_v1, %v432_v1  ;;  %v435_v4 = vmul.f32 %v433_v2, %v433_v2  ;;  %v2470_v7 = vld [vmem:[#allocation5 + $0x4] ss:$16 sps:$4 sm:$0xff]   ;;  %v2472_v8 = vld [vmem:[#allocation5] ss:$16 sps:$4 sm:$0xff]   ;;  %593 = vmatprep.mubr.bf16.mxu1 %v2702_v12  ;;  %2464 = vset.pattern.permute.xlu0 %v2702_v12  ;;  %v2484_v16 = vld [vmem:[#allocation5 + $0xc] ss:$16 sps:$4 sm:$0xff]  }
  0x4d   : > { %561 = vmatprep.subr.bf16.mxu1 %v2470_v7  ;;  %v2473_v9 = vld [vmem:[#allocation5 + $0x24] ss:$16 sps:$4 sm:$0xff]   ;;  %v2475_v10 = vld [vmem:[#allocation5 + $0x20] ss:$16 sps:$4 sm:$0xff]   ;;  %2463 = vset.pattern.permute.xlu1 %v2702_v12  ;;  %v2482_v30 = vld [vmem:[#allocation5 + $0x8] ss:$16 sps:$4 sm:$0xff]  }
  0x4e   : > { %v437_v5 = vsel %vm436_vm1, %v434_v3, 0.0  ;;  %v440_v6 = vsel %vm436_vm1, %v435_v4, 0.0  ;;  %562 = vmatpush1.bf16.msra.mxu1 %v2472_v8  ;;  %v2476_v11 = vld [vmem:[#allocation5 + $0x44] ss:$16 sps:$4 sm:$0xff]   ;;  %v2478_v13 = vld [vmem:[#allocation5 + $0x40] ss:$16 sps:$4 sm:$0xff]  }
  0x4f   : > { %438 = vadd.xlane.f32.xlu0 %v437_v5  ;;  %563 = vmatprep.subr.bf16.mxu1 %v2473_v9  ;;  %v2479_v14 = vld [vmem:[#allocation5 + $0x64] ss:$16 sps:$4 sm:$0xff]   ;;  %v2481_v15 = vld [vmem:[#allocation5 + $0x60] ss:$16 sps:$4 sm:$0xff]   ;;  %v2487_v32 = vld [vmem:[#allocation5 + $0x2c] ss:$16 sps:$4 sm:$0xff]  }
  0x50   : > { %v2173_v26 = vld [vmem:[%s3396_s1] ss:$0 sm:$0xff]  ;;  %v2485_v33 = vld [vmem:[#allocation5 + $0x28] ss:$16 sps:$4 sm:$0xff]   ;;  %v2490_v34 = vld [vmem:[#allocation5 + $0x4c] ss:$16 sps:$4 sm:$0xff]  }
  0x51   : > { %v2488_v35 = vld [vmem:[#allocation5 + $0x48] ss:$16 sps:$4 sm:$0xff]   ;;  %v2493_v36 = vld [vmem:[#allocation5 + $0x6c] ss:$16 sps:$4 sm:$0xff]   ;;  %v2922_v39 = vshrl.u32 %v659_v38, 7  ;;  %v2933_v42 = vld [vmem:[%s3398_s3] sm:$0xff] }
  0x52   : > { %564 = vmatpush1.bf16.msra.mxu1 %v2475_v10  ;;  %v2491_v37 = vld [vmem:[#allocation5 + $0x68] ss:$16 sps:$4 sm:$0xff]   ;;  %v2941_v47 = vand.u32 127, %v659_v38  ;;  %v2703_v48 = vmov 0.0   ;;  %vm2704_vm4 = vmmov 0   ;;  %v651_v54 = vld [vmem:[#allocation3] sm:$0xff] }
  0x53   : > { %441 = vadd.xlane.f32.xlu0 %v440_v6  ;;  %565 = vmatprep.subr.bf16.mxu1 %v2476_v11  ;;  %v2925_v40 = vsub.s32 2, %v2922_v39  ;;  %v2928_v41 = vsub.s32 3, %v2922_v39  ;;  %v2954_v50 = vsub.s32 1, %v2922_v39  ;;  %v2959_v52 = vsub.s32 0, %v2922_v39  ;;  %v2970_v61 = vld [vmem:[%s3399_s4] sm:$0x3] }
  0x54   : > { %vm956_vm2 = vcmp.ge.s32.totalorder %v2922_v39, %v2941_v47  ;;  %vm719_vm5 = vcmask 1046528   ;;  %vm772_vm6 = vcmask 1045504   ;;  %vm821_vm7 = vcmask 1044480   ;;  %s2707_s25 = smov 127   ;;  %s2230_s19 = sshll.u32 %s2684_s17, 2 }
  0x55   : > { %v745_v43 = vrot.slane %v2933_v42, %v2925_v40  ;;  %v798_v44 = vrot.slane %v2933_v42, %v2928_v41  ;;  %v2946_v49 = vsel %vm956_vm2, 1.0, %v2703_v48  ;;  %v692_v51 = vrot.slane %v2933_v42, %v2954_v50  ;;  %s2064_s24 = sadd.s32 %s2230_s19, %s2877_s26  ;;  %s3343_s17 = scalar_lea.sflag [#allocation7], %s390_s22 }
  0x56   : > { %566 = vmatpush1.bf16.msra.mxu1 %v2478_v13  ;;  %2277 = vmatprep.mubr.msk.f32.mxu0 %vm962_vm3, %v2946_v49  ;;  %v662_v55 = vrot.slane %v2933_v42, %v2959_v52  ;;  %v845_v9 = vrot.slane %v2970_v61, %v2959_v52  ;;  %vm1111_vm13 = vsmask.f32 5376  ;;  %vm1371_vm14 = vcmask 1042432   ;;  %s2231_s16 = sshll.u32 %s2064_s24, 7  ;;  %p3426_p0 = scmp.ne.s32.totalorder %s3417_s27, 0 }
  0x57   : > { %567 = vmatprep.subr.bf16.mxu1 %v2479_v14  ;;  %v755_v45 = vrot.slane %v745_v43, %v2925_v40  ;;  %v808_v46 = vrot.slane %v798_v44, %v2928_v41  ;;  %v702_v53 = vrot.slane %v692_v51, %v2954_v50  ;;  %vm1739_vm15 = vcmask 1048064  }
  0x58   : > { %v672_v58 = vrot.slane %v662_v55, %v2959_v52 }
  0x59   : > { %v707_v56 = vmul.f32 %v702_v53, %v651_v54  ;;  %v760_v57 = vmul.f32 %v755_v45, %v651_v54 }
  0x5a   : > { %568 = vmatpush1.bf16.msra.mxu1 %v2481_v15  ;;  %v677_v63 = vmul.f32 %v672_v58, %v651_v54 }
  0x5b   : > { %604 = vmatprep.subr.bf16.mxu1 %v2484_v16  ;;  %v720_v60 = vrot.slane %v707_v56, 1  ;;  %v773_v0 = vrot.slane %v760_v57, 2 }
  0xdc   : > { %v439_v17 = vpop.xlane.xlu0 %438 }
  0xdd   : > { %v444_v18 = vmul.f32 0.015625, %v439_v17 }
  0xdf   : > { %v446_v19 = vadd.f32 1e-05, %v444_v18  ;;  %v801_v18 = vsub.s32 7, %v2922_v39 }
  0xe0   : > { %v442_v20 = vpop.xlane.xlu0 %441 }
  0xe1   : > { %2502 = vrsqrt.f32 %v446_v19  ;;  %v445_v21 = vmul.f32 0.015625, %v442_v20 }
  0xe3   : > { %v447_v22 = vadd.f32 1e-05, %v445_v21 }
  0xe5   : > { %2504 = vrsqrt.f32 %v447_v22 }
  0xeb   : > { %v2503_v23 = vpop.eup %2502 }
  0xec   : > { %v450_v24 = vmul.f32 %v2503_v23, %v432_v1  ;;  %v695_v1 = vsub.s32 5, %v2922_v39 }
  0xee   : > { %v459_v28 = vmul.f32 %v2173_v26, %v450_v24  ;;  %v696_v17 = vrot.slane %v2933_v42, %v695_v1 }
  0xef   : > { %v2505_v25 = vpop.eup %2504 }
  0xf0   : > { %v451_v27 = vmul.f32 %v2505_v25, %v433_v2  ;;  %v748_v2 = vsub.s32 6, %v2922_v39 }
  0xf2   : > { %v460_v29 = vmul.f32 %v2173_v26, %v451_v27  ;;  %v749_v22 = vrot.slane %v2933_v42, %v748_v2 }
  0xf4   : > { %v461_v31 = vpack.c.bf16 %v460_v29, %v459_v28  ;;  %v759_v44 = vrot.slane %v749_v22, %v2925_v40 }
  0xf6   : > { %2190 = vmatmul.mubr.msk.bf16.vlgmr.msra.gmra.mrb[0].mxu1 %vm436_vm1, %v461_v31 }
  0xf7   : > { %605 = vmatpush1.bf16.msra.mxu1 %v2482_v30  ;;  %636 = vmatprep.mubr.bf16.mxu1 %v2702_v12  ;;  %v665_v30 = vsub.s32 4, %v2922_v39 }
  0xf8   : > { %606 = vmatprep.subr.bf16.mxu1 %v2487_v32 }
  0xfb   : > { %607 = vmatpush1.bf16.msra.mxu1 %v2485_v33 }
  0xfc   : > { %608 = vmatprep.subr.bf16.mxu1 %v2490_v34  ;;  %v706_v34 = vrot.slane %v696_v17, %v2954_v50 }
  0xff   : > { %609 = vmatpush1.bf16.msra.mxu1 %v2488_v35 }
 0x100   : > { %610 = vmatprep.subr.bf16.mxu1 %v2493_v36  ;;  %v652_v36 = vld [vmem:[#allocation3 + $0x8] sm:$0xff] }
 0x101   : > { %v708_v54 = vmul.f32 %v706_v34, %v652_v36 }
 0x103   : > { %611 = vmatpush1.bf16.msra.mxu1 %v2491_v37  ;;  %v802_v37 = vrot.slane %v2933_v42, %v801_v18 }
 0x104   : > { %2280 = vmatprep.subr.bf16.mxu1 %v2703_v48 }
 0x105   : > { %v812_v56 = vrot.slane %v802_v37, %v2928_v41 }
 0x106   : > { %2191 = vmatmul.mubr.msk.bf16.vlgmr.msra.gmra.mrb[4].mxu1 %vm436_vm1, %v461_v31 }
 0x107   : > { %2282 = vmatprep.mubr.msk.bf16.mxu1 %vm2704_vm4, %v2703_v48 }
 0x1c9   : > { %v2965_v59 = vpop.f32.mrb[0].mxu1 }
 0x1ca   : > { %v597_v62 = vpop.f32.mrb[1].mxu1 }
 0x1cb   : > { %v2974_v3 = vpop.f32.mrb[2].mxu1  ;;  %v679_v4 = vmul.f32 %v672_v58, %v597_v62  ;;  %v709_v5 = vmul.f32 %v702_v53, %v597_v62  ;;  %v762_v6 = vmul.f32 %v755_v45, %v597_v62  ;;  %v813_v7 = vmul.f32 %v808_v46, %v597_v62 }
 0x1cc   : > { %v601_v8 = vpop.f32.mrb[3].mxu1 }
 0x1cd   : > { %v681_v10 = vmul.f32 %v672_v58, %v601_v8  ;;  %v711_v11 = vmul.f32 %v702_v53, %v601_v8  ;;  %v721_v13 = vrot.slane %v709_v5, 1  ;;  %v764_v14 = vmul.f32 %v755_v45, %v601_v8  ;;  %900 = vst [vmem:[#allocation3] sm:$0xff] %v601_v8  ;;  %v2198_v58 = vld [vmem:[%s3400_s5] ss:$0 sm:$0xff] }
 0x1ce   : > { %v774_v15 = vrot.slane %v762_v6, 2  ;;  %v815_v16 = vmul.f32 %v808_v46, %v601_v8  ;;  %v822_v25 = vrot.slane %v813_v7, 3  ;;  %v666_v46 = vrot.slane %v2933_v42, %v665_v30 }
 0x1cf   : > { %v722_v19 = vsel %vm719_vm5, %v720_v60, %v721_v13  ;;  %v726_v20 = vrot.slane %v711_v11, 1  ;;  %v779_v21 = vrot.slane %v764_v14, 2  ;;  %v761_v60 = vmul.f32 %v759_v44, %v652_v36 }
 0x1d0   : > { %v736_v23 = vadd.f32 %v722_v19, %v677_v63  ;;  %v775_v24 = vsel %vm772_vm6, %v773_v0, %v774_v15  ;;  %v824_v26 = vrot.slane %v815_v16, 3  ;;  %v676_v40 = vrot.slane %v666_v46, %v2959_v52 }
 0x1d1   : > { %v727_v27 = vsel %vm719_vm5, %v721_v13, %v726_v20  ;;  %v740_v28 = vadd.f32 %v726_v20, %v681_v10  ;;  %v780_v29 = vsel %vm772_vm6, %v774_v15, %v779_v21  ;;  %v723_v0 = vrot.slane %v708_v54, 1  ;;  %v939_v54 = vld [vmem:[%s3401_s6] sm:$0x1] }
 0x1d2   : > { %v738_v31 = vadd.f32 %v727_v27, %v679_v4  ;;  %v789_v32 = vadd.f32 %v775_v24, %v736_v23  ;;  %v825_v33 = vsel %vm821_vm7, %v822_v25, %v824_v26  ;;  %v678_v4 = vmul.f32 %v676_v40, %v652_v36 }
 0x1d3   : > { %v793_v35 = vadd.f32 %v779_v21, %v740_v28  ;;  %v776_v8 = vrot.slane %v761_v60, 2 }
 0x1d4   : > { %v791_v38 = vadd.f32 %v780_v29, %v738_v31  ;;  %v834_v43 = vadd.f32 %v822_v25, %v789_v32 }
 0x1d5   : > { %v838_v45 = vadd.f32 %v824_v26, %v793_v35 }
 0x1d6   : > { %v836_v51 = vadd.f32 %v825_v33, %v791_v38  ;;  %v2993_v53 = vadd.f32 %v845_v9, %v834_v43 }
 0x1d7   : > { %v2995_v55 = vadd.f32 %v845_v9, %v838_v45 }
 0x1d8   : > { %v2998_v57 = vadd.f32 %v845_v9, %v836_v51  ;;  %v849_v9 = vrot.slane %v2970_v61, %v2954_v50 }
 0x1d9   : > { %v638_v62 = vpop.f32.mrb[4].mxu1 }
 0x1da   : > { %v640_v63 = vpop.f32.mrb[5].mxu1  ;;  %v710_v42 = vmul.f32 %v706_v34, %v638_v62  ;;  %v763_v5 = vmul.f32 %v759_v44, %v638_v62  ;;  %v814_v6 = vmul.f32 %v812_v56, %v638_v62  ;;  %v680_v13 = vmul.f32 %v676_v40, %v638_v62 }
 0x1db   : > { %v3004_v1 = vadd.f32 %v2198_v58, %v640_v63  ;;  %v642_v2 = vpop.f32.mrb[6].mxu1 }
 0x1dc   : > { %v712_v41 = vmul.f32 %v706_v34, %v642_v2  ;;  %v724_v7 = vrot.slane %v710_v42, 1  ;;  %901 = vst [vmem:[#allocation3 + $0x8] sm:$0xff] %v642_v2  ;;  %v644_v10 = vpop.f32.mrb[7].mxu1  ;;  %v682_v14 = vmul.f32 %v676_v40, %v642_v2  ;;  %v765_v15 = vmul.f32 %v759_v44, %v642_v2 }
 0x1dd   : > { %v913_v11 = vmin.f32 %v3004_v1, 20.0  ;;  %v777_v19 = vrot.slane %v763_v5, 2  ;;  %v816_v20 = vmul.f32 %v812_v56, %v642_v2  ;;  %v823_v24 = vrot.slane %v814_v6, 3 }
 0x1de   : > { %v725_v16 = vsel %vm719_vm5, %v723_v0, %v724_v7  ;;  %v728_v17 = vrot.slane %v712_v41, 1  ;;  %v781_v23 = vrot.slane %v765_v15, 2  ;;  %v910_v33 = vadd.f32 %v2198_v58, %v644_v10 }
 0x1df   : > { %v915_v21 = vmul.f32 1.442695, %v913_v11  ;;  %v737_v22 = vadd.f32 %v725_v16, %v678_v4  ;;  %v778_v61 = vsel %vm772_vm6, %v776_v8, %v777_v19  ;;  %v826_v27 = vrot.slane %v816_v20, 3 }
 0x1e0   : > { %v729_v25 = vsel %vm719_vm5, %v724_v7, %v728_v17  ;;  %v741_v26 = vadd.f32 %v728_v17, %v682_v14  ;;  %v782_v29 = vsel %vm772_vm6, %v777_v19, %v781_v23  ;;  %v914_v36 = vmin.f32 %v910_v33, 20.0 }
 0x1e1   : > { %2506 = vpow2.f32 %v915_v21  ;;  %v739_v28 = vadd.f32 %v729_v25, %v680_v13  ;;  %v790_v30 = vadd.f32 %v778_v61, %v737_v22  ;;  %v827_v32 = vsel %vm821_vm7, %v823_v24, %v826_v27 }
 0x1e2   : > { %v794_v31 = vadd.f32 %v781_v23, %v741_v26  ;;  %v917_v44 = vmul.f32 1.442695, %v914_v36  ;;  %v940_v58 = vmul.f32 1.442695, %v939_v54  ;;  %vm911_vm9 = vcmp.gt.f32.partialorder %v3004_v1, 20.0  ;;  %v3028_v54 = vld [vmem:[#allocation2] sm:$0xff] }
 0x1e3   : > { %v792_v34 = vadd.f32 %v782_v29, %v739_v28  ;;  %v835_v35 = vadd.f32 %v823_v24, %v790_v30  ;;  %vm912_vm11 = vcmp.gt.f32.partialorder %v910_v33, 20.0 }
 0x1e4   : > { %v839_v37 = vadd.f32 %v826_v27, %v794_v31  ;;  %2508 = vpow2.f32 %v917_v44  ;;  %v953_v27 = vadd.s32 8, %v2922_v39 }
 0x1e5   : > { %v837_v38 = vadd.f32 %v827_v32, %v792_v34  ;;  %v853_v43 = vadd.f32 %v849_v9, %v835_v35 }
 0x1e6   : > { %v857_v45 = vadd.f32 %v849_v9, %v839_v37  ;;  %vm957_vm12 = vcmp.ge.s32.totalorder %v953_v27, %v2941_v47 }
 0x1e7   : > { %v2193_v46 = vmul.f32 -1.442695, %v853_v43  ;;  %v855_v51 = vadd.f32 %v849_v9, %v837_v38 }
 0x1e8   : > { %v2197_v60 = vmul.f32 -1.442695, %v857_v45 }
 0x1e9   : > { %v2195_v56 = vmul.f32 -1.442695, %v855_v51  ;;  %2510 = vpow2.f32 %v2193_v46 }
 0x1eb   : > { %v2507_v62 = vpop.eup %2506  ;;  %2512 = vpow2.f32 %v2195_v56  ;;  %v3033_v56 = vsel %vm957_vm12, 1.0, %v2703_v48 }
 0x1ec   : > { %v919_v40 = vadd.f32 1.0, %v2507_v62  ;;  %2514 = vpow2.f32 %v2197_v60  ;;  %v922_v0 = vmul.f32 -0.5, %v2507_v62  ;;  %v925_v13 = vand.u32 2147483647, %v2507_v62 }
 0x1ee   : > { %2516 = vlog2.f32 %v919_v40  ;;  %v2509_v63 = vpop.eup %2508  ;;  %v923_v8 = vadd.f32 1.0, %v922_v0  ;;  %vm926_vm8 = vcmp.lt.f32.partialorder %v925_v13, 0.0004427343  ;;  %v3069_v13 = vld [vmem:[#allocation2 + $0x38] sm:$0xff] }
 0x1ef   : > { %2518 = vpow2.f32 %v940_v58  ;;  %v928_v42 = vadd.f32 1.0, %v2509_v63  ;;  %v931_v9 = vmul.f32 -0.5, %v2509_v63  ;;  %v934_v19 = vand.u32 2147483647, %v2509_v63 }
 0x1f0   : > { %v924_v15 = vmul.f32 %v2507_v62, %v923_v8  ;;  %v3061_v8 = vld [vmem:[#allocation2 + $0x28] sm:$0xff] }
 0x1f1   : > { %2520 = vlog2.f32 %v928_v42  ;;  %v932_v16 = vadd.f32 1.0, %v931_v9  ;;  %vm935_vm10 = vcmp.lt.f32.partialorder %v934_v19, 0.0004427343  ;;  %v2192_v19 = vmul.f32 -1.442695, %v2993_v53 }
 0x1f3   : > { %v2511_v2 = vpop.eup %2510  ;;  %v933_v23 = vmul.f32 %v2509_v63, %v932_v16  ;;  %v2194_v16 = vmul.f32 -1.442695, %v2998_v57 }
 0x1f4   : > { %v877_v5 = vadd.f32 1.0, %v2511_v2 }
 0x1f5   : > { %v2513_v4 = vpop.eup %2512 }
 0x1f6   : > { %v2515_v6 = vpop.eup %2514  ;;  %v879_v41 = vadd.f32 1.0, %v2513_v4  ;;  %2522 = vrcp.f32 %v877_v5  ;;  %v3050_v4 = vld [vmem:[#allocation2 + $0x10] sm:$0xff]  ;;  %v3052_v5 = vld [vmem:[#allocation2 + $0x18] sm:$0xff] }
 0x1f7   : > { %v881_v10 = vadd.f32 1.0, %v2515_v6  ;;  %v1222_v6 = vpack.c.bf16 %v3052_v5, %v3050_v4 }
 0x1f8   : > { %v2517_v7 = vpop.eup %2516  ;;  %2524 = vrcp.f32 %v879_v41 }
 0x1f9   : > { %v2519_v11 = vpop.eup %2518  ;;  %v921_v14 = vmul.f32 0.6931472, %v2517_v7  ;;  %2526 = vrcp.f32 %v881_v10  ;;  %v1229_v41 = vsel %vm436_vm1, %v1222_v6, 0  ;;  %v3059_v7 = vld [vmem:[#allocation2 + $0x20] sm:$0xff] }
 0x1fa   : > { %v942_v17 = vsub.f32 0.0, %v2519_v11  ;;  %v1223_v9 = vpack.c.bf16 %v3061_v8, %v3059_v7  ;;  %v3067_v11 = vld [vmem:[#allocation2 + $0x30] sm:$0xff]  ;;  %2528 = vpow2.f32 %v2194_v16 }
 0x1fb   : > { %v927_v20 = vsel %vm926_vm8, %v924_v15, %v921_v14  ;;  %v2521_v21 = vpop.eup %2520  ;;  %v1224_v14 = vpack.c.bf16 %v3069_v13, %v3067_v11 }
 0x1fc   : > { %v930_v22 = vmul.f32 0.6931472, %v2521_v21  ;;  %v947_v24 = vrot.slane %v942_v17, %v2959_v52  ;;  %v3020_v25 = vsel %vm911_vm9, %v3004_v1, %v927_v20  ;;  %v1232_v10 = vsel %vm436_vm1, %v1223_v9, 0 }
 0x1fd   : > { %v1235_v15 = vsel %vm436_vm1, %v1224_v14, 0  ;;  %v2196_v17 = vmul.f32 -1.442695, %v2995_v55 }
 0x1fe   : > { %v936_v61 = vsel %vm935_vm10, %v933_v23, %v930_v22  ;;  %v949_v31 = vmul.f32 %v947_v24, %v3020_v25 }
 0x1ff   : > { %v3023_v29 = vsel %vm912_vm11, %v910_v33, %v936_v61  ;;  %v3030_v33 = vld [vmem:[#allocation2 + $0x8] sm:$0xff]  ;;  %2530 = vpow2.f32 %v2196_v17 }
 0x200   : > { %v2523_v26 = vpop.eup %2522  ;;  %v950_v32 = vmul.f32 %v947_v24, %v3023_v29  ;;  %v1221_v58 = vpack.c.bf16 %v3030_v33, %v3028_v54  ;;  %2532 = vpow2.f32 %v2192_v19 }
 0x201   : > { %v895_v34 = vmul.f32 %v2523_v26, %v853_v43 }
 0x202   : > { %v2525_v28 = vpop.eup %2524  ;;  %v2362_v37 = vpack.c.bf16 %v950_v32, %v949_v31  ;;  %v1226_v0 = vsel %vm436_vm1, %v1221_v58, 0 }
 0x203   : > { %v2527_v30 = vpop.eup %2526  ;;  %v897_v35 = vmul.f32 %v2525_v28, %v855_v51 }
 0x204   : > { %v899_v36 = vmul.f32 %v2527_v30, %v857_v45  ;;  %2363 = vmatprep.subr.bf16.mxu0 %v2362_v37  ;;  %v2529_v20 = vpop.eup %2528 }
 0x205   : > { %v1109_v1 = vpack.c.bf16 %v897_v35, %v895_v34  ;;  %2365 = vmatpush3.bf16.msra.mxu0 %v2362_v37  ;;  %v878_v23 = vadd.f32 1.0, %v2529_v20 }
 0x206   : > { %v1110_v38 = vpack.c.bf16 %v899_v36, %v899_v36  ;;  %2286 = vmatprep.subr.bf16.mxu0 %v2703_v48 }
 0x207   : > { %v1113_v44 = vshrl.u32 %v1109_v1, 16  ;;  %v1116_v46 = vshll.u32 %v1109_v1, 16  ;;  %2534 = vrcp.f32 %v878_v23 }
 0x208   : > { %v1121_v60 = vshrl.u32 %v1110_v38, 16  ;;  %v1124_v43 = vshll.u32 %v1110_v38, 16  ;;  %2278 = vmatmul.mubr.msk.f32.vlgmr.msra.gmra.mrb[0].mxu0 %vm962_vm3, %v3033_v56 }
 0x209   : > { %v1115_v51 = vrot.slane %v1113_v44, 2  ;;  %v1118_v45 = vrot.slane %v1116_v46, 3  ;;  %2294 = vmatprep.mubr.msk.bf16.mxu0 %vm2704_vm4, %v2703_v48  ;;  %v2531_v21 = vpop.eup %2530 }
 0x20a   : > { %v1123_v47 = vrot.slane %v1121_v60, 2  ;;  %v1126_v62 = vrot.slane %v1124_v43, 3  ;;  %v2533_v22 = vpop.eup %2532  ;;  %v880_v24 = vadd.f32 1.0, %v2531_v21 }
 0x20b   : > { %v1119_v40 = vor.u32 %v1118_v45, %v1115_v51  ;;  %v876_v26 = vadd.f32 1.0, %v2533_v22 }
 0x20c   : > { %v1127_v63 = vor.u32 %v1126_v62, %v1123_v47  ;;  %2536 = vrcp.f32 %v880_v24 }
 0x20d   : > { %2538 = vrcp.f32 %v876_v26 }
 0x20e   : > { %v3043_v42 = vsel %vm1111_vm13, %v1119_v40, %v1127_v63  ;;  %2287 = vmatpush3.bf16.xpose.msra.mxu0 %v1226_v0 }
 0x20f   : > { %1129 = vrot.lane.b32.xlu1 %v3043_v42, %s2705_s18  ;;  %v1135_v2 = vsel %vm436_vm1, %v3043_v42, 0  ;;  %2288 = vmatprep.subr.bf16.mxu0 %v2703_v48 }
 0x210   : > { %2281 = vmatpush3.bf16.xpose.msra.mxu1 %v1135_v2 }
 0x211   : > { %2298 = vmatprep.subr.bf16.mxu1 %v2703_v48  ;;  %v2535_v61 = vpop.eup %2534 }
 0x212   : > { %v3080_v30 = vmul.f32 %v2535_v61, %v2998_v57 }
 0x216   : > { %2289 = vmatpush3.bf16.xpose.msra.mxu0 %v1229_v41  ;;  %v2537_v27 = vpop.eup %2536 }
 0x217   : > { %2290 = vmatprep.subr.bf16.mxu0 %v2703_v48  ;;  %v2539_v28 = vpop.eup %2538  ;;  %v3083_v31 = vmul.f32 %v2537_v27, %v2995_v55 }
 0x218   : > { %v3086_v32 = vmul.f32 %v2539_v28, %v2993_v53 }
 0x219   : > { %v1212_v35 = vpack.c.bf16 %v3083_v31, %v3083_v31 }
 0x21a   : > { %v1211_v34 = vpack.c.bf16 %v3080_v30, %v3086_v32 }
 0x21b   : > { %v1303_v1 = vshrl.u32 %v1212_v35, 16  ;;  %v1306_v38 = vshll.u32 %v1212_v35, 16 }
 0x21c   : > { %v1295_v36 = vshrl.u32 %v1211_v34, 16  ;;  %v1298_v37 = vshll.u32 %v1211_v34, 16 }
 0x21d   : > { %v1305_v57 = vrot.slane %v1303_v1, 2  ;;  %v1308_v60 = vrot.slane %v1306_v38, 3 }
 0x21e   : > { %2291 = vmatpush3.bf16.xpose.msra.mxu0 %v1232_v10  ;;  %v1297_v44 = vrot.slane %v1295_v36, 2  ;;  %v1300_v46 = vrot.slane %v1298_v37, 3 }
 0x21f   : > { %2292 = vmatprep.subr.bf16.mxu0 %v2703_v48  ;;  %v1309_v55 = vor.u32 %v1308_v60, %v1305_v57 }
 0x220   : > { %v1301_v43 = vor.u32 %v1300_v46, %v1297_v44 }
 0x222   : > { %v1310_v53 = vsel %vm1111_vm13, %v1301_v43, %v1309_v55 }
 0x226   : > { %2293 = vmatpush3.bf16.xpose.msra.mxu0 %v1235_v15 }
 0x227   : > { %2326 = vmatprep.subr.bf16.mxu0 %v2703_v48 }
 0x281   : > { %v3092_v51 = vpop.permute.xlu1 %1129 }
 0x282   : > { %2283 = vmatmul.mubr.msk.bf16.vlgmr.msra.gmra.mrb[8].mxu1 %vm436_vm1, %v3092_v51  ;;  %2295 = vmatmul.mubr.msk.bf16.vlgmr.msra.gmra.mrb[4].mxu0 %vm436_vm1, %v3092_v51 }
 0x283   : > { %2299 = vmatpush3.bf16.msra.mxu1 %v1310_v53  ;;  %2300 = vmatprep.mubr.msk.bf16.mxu1 %vm2704_vm4, %v2703_v48 }
 0x284   : > { %2304 = vmatprep.subr.bf16.mxu1 %v3043_v42  ;;  %2328 = vmatprep.mubr.msk.bf16.mxu0 %vm2704_vm4, %v2703_v48 }
 0x2db   : > { %v2279_v45 = vpop.f32.mrb[0].mxu0 }
 0x2dc   : > { %v1280_v47 = vmul.f32 1.442695, %v2279_v45  ;;  %v1035_v62 = vpop.f32.mrb[1].mxu0  ;;  %v1386_v58 = vrot.slane %v2279_v45, %v801_v18  ;;  %v2706_v18 = vmov 1  }
 0x2dd   : > { %v1278_v15 = vmul.f32 1.442695, %v1035_v62 }
 0x2de   : > { %2540 = vpow2.f32 %v1280_v47  ;;  %v1387_v40 = vsub.f32 %v1386_v58, %v1035_v62  ;;  %v1388_v63 = vsub.f32 %v1386_v58, %v2279_v45  ;;  %v2206_v58 = vld [vmem:[%s3402_s7] ss:$0 sm:$0xff] }
 0x2e0   : > { %v1389_v0 = vmul.f32 1.442695, %v1387_v40  ;;  %v1391_v2 = vmul.f32 1.442695, %v1388_v63 }
 0x2e2   : > { %2542 = vpow2.f32 %v1389_v0 }
 0x2e3   : > { %2544 = vpow2.f32 %v1391_v2 }
 0x2e4   : > { %2546 = vpow2.f32 %v1278_v15 }
 0x2e8   : > { %v3106_v6 = vpop.eup %2540 }
 0x2e9   : > { %v1526_v41 = vrot.slane %v3106_v6, 7 }
 0x2eb   : > { %2366 = vpush %v1526_v41 }
 0x2ec   : > { %v2543_v9 = vpop.eup %2542 }
 0x2ed   : > { %v2545_v10 = vpop.eup %2544  ;;  %v1393_v14 = vmul.f32 %v2543_v9, %v3020_v25 }
 0x2ee   : > { %v3113_v39 = vmul.f32 %v2545_v10, %v3023_v29  ;;  %v3121_v16 = vpop.eup %2546 }
 0x2ef   : > { %1397 = vperm.xlu1 %2463, %v1393_v14  }
 0x2f0   : > { %1401 = vperm.xlu0 %2464, %v3113_v39  }
 0x2f3   : > { %1180 = vperm.xlu1 %2463, %v1035_v62  }
 0x2f4   : > { %2465 = vset.pattern.permute.xlu0 %v2706_v18 }
 0x2f5   : > { %1555 = vperm.xlu0 %2465, %v1035_v62  }
 0x2f7   : > { %1185 = vperm.xlu1 %2463, %v2279_v45  }
 0x2f9   : > { %1559 = vperm.xlu0 %2465, %v2279_v45  }
 0x31c   : > { %s2367_s23 = spop %2366 }
 0x320   : > { %1044 = vxpose.xlu1.b32.start [1/2] (short) (narrow) %v1035_v62, 8 }
 0x324   : > { %1045 = vxpose.xlu1.b32.end [2/2] (short) (narrow) %v2279_v45, 8 }
 0x328   : > { %1076 = vxpose.xlu1.b32.start [1/2] (short) (narrow) %v3020_v25, 8 }
 0x32c   : > { %1077 = vxpose.xlu1.b32.end [2/2] (short) (narrow) %v3023_v29, 8 }
 0x34a   : > { %1661 = vrot.lane.b32.xlu1 %v1310_v53, %s2705_s18 }
 0x34b   : > { %2466 = vset.pattern.permute.xlu1 %v2706_v18 }
 0x34e   : > { %1652 = vperm.xlu1 %2466, %v3121_v16  }
 0x352   : > { %1656 = vperm.xlu1 %2466, %v3106_v6  }
 0x355   : > { %v3125_v17 = vpop.f32.mrb[8].mxu1  ;;  %v3127_v19 = vpop.f32.mrb[4].mxu0 }
 0x356   : > { %v2284_v20 = vpop.f32.mrb[9].mxu1  ;;  %v2296_v25 = vpop.f32.mrb[5].mxu0 }
 0x357   : > { %v3129_v21 = vpop.f32.mrb[10].mxu1  ;;  %v3131_v29 = vpop.f32.mrb[6].mxu0 }
 0x358   : > { %v2285_v22 = vpop.f32.mrb[11].mxu1  ;;  %v2297_v23 = vpop.f32.mrb[7].mxu0 }
 0x36e   : > { %v1398_v24 = vpop.permute.xlu1 %1397 }
 0x36f   : > { %v1402_v26 = vpop.permute.xlu0 %1401  ;;  %v1403_v61 = vrot.slane %v1398_v24, 3 }
 0x370   : > { %v1404_v27 = vrot.slane %v1402_v26, 3 }
 0x371   : > { %v1409_v28 = vmul.f32 %v1403_v61, %v3086_v32 }
 0x372   : > { %v1411_v34 = vmul.f32 %v1404_v27, %v3083_v31  ;;  %v1405_v35 = vsel %vm821_vm7, %v1403_v61, %v1404_v27  ;;  %v1181_v40 = vpop.permute.xlu1 %1180 }
 0x373   : > { %v1410_v36 = vmul.f32 %v1405_v35, %v3080_v30 }
 0x374   : > { %v1413_v37 = vpack.c.bf16 %v1411_v34, %v1411_v34  ;;  %v1556_v63 = vpop.permute.xlu0 %1555 }
 0x375   : > { %v1412_v1 = vpack.c.bf16 %v1410_v36, %v1409_v28 }
 0x376   : > { %v1423_v38 = vshrl.u32 %v1413_v37, 16  ;;  %v1426_v44 = vshll.u32 %v1413_v37, 16  ;;  %v1186_v0 = vpop.permute.xlu1 %1185 }
 0x377   : > { %v1415_v46 = vshrl.u32 %v1412_v1, 16  ;;  %v1418_v57 = vshll.u32 %v1412_v1, 16 }
 0x378   : > { %v1425_v60 = vrot.slane %v1423_v38, 2  ;;  %v1428_v43 = vrot.slane %v1426_v44, 3  ;;  %v1560_v15 = vpop.permute.xlu0 %1559 }
 0x379   : > { %v1417_v55 = vrot.slane %v1415_v46, 2  ;;  %v1420_v53 = vrot.slane %v1418_v57, 3 }
 0x37a   : > { %v1429_v45 = vor.u32 %v1428_v43, %v1425_v60 }
 0x37b   : > { %v1421_v47 = vor.u32 %v1420_v53, %v1417_v55 }
 0x37d   : > { %v1430_v62 = vsel %vm1111_vm13, %v1421_v47, %v1429_v45 }
 0x37e   : > { %1432 = vxpose.xlu0.c.b16.start.end [1/1] (short) (narrow) %v1430_v62, 64 }
 0x393   : > { %1709 = vperm.xlu0 %2465, %v2206_v58  }
 0x397   : > { %1743 = vperm.xlu0 %2465, %v1393_v14  }
 0x39b   : > { %2467 = vset.pattern.permute.xlu0 %v2702_v12 }
 0x39c   : > { %1362 = vperm.xlu0 %2467, %v2206_v58  }
 0x3a0   : > { %v1060_v2 = vpop.trf.xlu1 }
 0x3a1   : > { %v1191_v9 = vrot.slane %v1060_v2, %v2959_v52  ;;  %v1565_v10 = vrot.slane %v1060_v2, %v2954_v50 }
 0x3a3   : > { %v1192_v20 = vsub.f32 %v1181_v40, %v1191_v9  ;;  %v1193_v25 = vsub.f32 %v1186_v0, %v1191_v9  ;;  %v1566_v22 = vsub.f32 %v1556_v63, %v1565_v10  ;;  %v1567_v23 = vsub.f32 %v1560_v15, %v1565_v10 }
 0x3a5   : > { %v1194_v24 = vmin.f32 %v1192_v20, 0.0  ;;  %v1195_v26 = vmin.f32 %v1193_v25, 0.0  ;;  %v1568_v61 = vmin.f32 %v1566_v22, 0.0  ;;  %v1569_v27 = vmin.f32 %v1567_v23, 0.0  ;;  %v3169_v20 = vld [vmem:[#allocation2 + $0x50] sm:$0xff]  ;;  %v3171_v25 = vld [vmem:[#allocation2 + $0x58] sm:$0xff] }
 0x3a7   : > { %v1196_v14 = vmul.f32 1.442695, %v1194_v24  ;;  %v1198_v28 = vmul.f32 1.442695, %v1195_v26  ;;  %v1570_v34 = vmul.f32 1.442695, %v1568_v61 }
 0x3a8   : > { %v1572_v35 = vmul.f32 1.442695, %v1569_v27  ;;  %v1092_v36 = vpop.trf.xlu1  ;;  %v3179_v26 = vld [vmem:[#allocation2 + $0x60] sm:$0xff]  ;;  %v3181_v61 = vld [vmem:[#allocation2 + $0x68] sm:$0xff] }
 0x3a9   : > { %2548 = vpow2.f32 %v1196_v14  ;;  %v1207_v44 = vrot.slane %v1092_v36, %v2959_v52  ;;  %v1581_v53 = vrot.slane %v1092_v36, %v2954_v50  ;;  %v3163_v50 = vld [vmem:[#allocation2 + $0x48] sm:$0xff]  ;;  %v1596_v27 = vpack.c.bf16 %v3181_v61, %v3179_v26 }
 0x3aa   : > { %2550 = vpow2.f32 %v1198_v28  ;;  %v3190_v28 = vld [vmem:[#allocation2 + $0x70] sm:$0xff] }
 0x3ab   : > { %2552 = vpow2.f32 %v1570_v34  ;;  %v1605_v14 = vsel %vm436_vm1, %v1596_v27, 0  ;;  %v3192_v34 = vld [vmem:[#allocation2 + $0x78] sm:$0xff] }
 0x3ac   : > { %2554 = vpow2.f32 %v1572_v35  ;;  %v1597_v35 = vpack.c.bf16 %v3192_v34, %v3190_v28 }
 0x3ae   : > { %v1608_v36 = vsel %vm436_vm1, %v1597_v35, 0 }
 0x3b3   : > { %v2549_v37 = vpop.eup %2548 }
 0x3b4   : > { %v2551_v1 = vpop.eup %2550  ;;  %v1200_v38 = vmul.f32 %v2549_v37, %v2946_v49 }
 0x3b5   : > { %v2553_v46 = vpop.eup %2552  ;;  %v1201_v57 = vmul.f32 %v2551_v1, %v3033_v56 }
 0x3b6   : > { %v2555_v60 = vpop.eup %2554  ;;  %v1202_v43 = vmul.f32 %v1200_v38, %v3125_v17  ;;  %v1574_v55 = vmul.f32 %v2553_v46, %v2946_v49  ;;  %v3161_v49 = vld [vmem:[#allocation2 + $0x40] sm:$0xff] }
 0x3b7   : > { %v1203_v45 = vmul.f32 %v1201_v57, %v3129_v21  ;;  %v1575_v47 = vmul.f32 %v2555_v60, %v3033_v56  ;;  %v1594_v56 = vpack.c.bf16 %v3163_v50, %v3161_v49 }
 0x3b8   : > { %v1576_v62 = vmul.f32 %v1574_v55, %v3125_v17  ;;  %v1208_v58 = vmul.f32 %v1207_v44, %v1202_v43 }
 0x3b9   : > { %v1577_v40 = vmul.f32 %v1575_v47, %v3129_v21  ;;  %v1209_v52 = vmul.f32 %v1207_v44, %v1203_v45  ;;  %v1599_v21 = vsel %vm436_vm1, %v1594_v56, 0 }
 0x3ba   : > { %v1582_v63 = vmul.f32 %v1581_v53, %v1576_v62 }
 0x3bb   : > { %v1210_v0 = vpack.c.bf16 %v1209_v52, %v1208_v58  ;;  %v1583_v2 = vmul.f32 %v1581_v53, %v1577_v40 }
 0x3bc   : > { %v1662_v9 = vpop.permute.xlu1 %1661 }
 0x3bd   : > { %v1584_v10 = vpack.c.bf16 %v1583_v2, %v1582_v63  ;;  %2301 = vmatmul.mubr.msk.bf16.vlgmr.msra.gmra.mrb[12].mxu1 %vm962_vm3, %v1210_v0  ;;  %2327 = vmatpush3.bf16.msra.mxu0 %v1662_v9 }
 0x3be   : > { %2305 = vmatpush3.bf16.msra.mxu1 %v3043_v42  ;;  %2332 = vmatprep.subr.bf16.mxu0 %v3043_v42 }
 0x3bf   : > { %2314 = vmatprep.subr.bf16.mxu1 %v2703_v48 }
 0x3c0   : > { %2329 = vmatmul.mubr.msk.bf16.vlgmr.msra.gmra.mrb[8].mxu0 %vm962_vm3, %v1584_v10 }
 0x3c1   : > { %2333 = vmatpush3.bf16.msra.mxu0 %v3043_v42  ;;  %v1595_v42 = vpack.c.bf16 %v3171_v25, %v3169_v20 }
 0x3c2   : > { %2342 = vmatprep.subr.bf16.mxu0 %v2703_v48 }
 0x3c3   : > { %v1602_v23 = vsel %vm436_vm1, %v1595_v42, 0 }
 0x3e4   : > { %v1440_v17 = vpop.trf.xlu0 }
 0x3e5   : > { %2306 = vmatprep.mubr.msk.bf16.mxu1 %vm962_vm3, %v1440_v17 }
 0x3e8   : > { %v1441_v15 = vpop.trf.xlu0 }
 0x3e9   : > { %2307 = vmatmul.mubr.msk.bf16.vlgmr.msra.gmra.mrb[16].mxu1 %vm962_vm3, %v1441_v15 }
 0x3ea   : > { %2315 = vmatpush3.bf16.xpose.msra.mxu1 %v1599_v21 }
 0x3eb   : > { %2316 = vmatprep.subr.bf16.mxu1 %v2703_v48 }
 0x3ec   : > { %v1442_v22 = vpop.trf.xlu0 }
 0x3ed   : > { %2310 = vmatprep.mubr.msk.bf16.mxu1 %vm962_vm3, %v1442_v22 }
 0x3f0   : > { %v1443_v24 = vpop.trf.xlu0 }
 0x3f1   : > { %2311 = vmatmul.mubr.msk.bf16.gmra.mrb[20].mxu1 %vm962_vm3, %v1443_v24 }
 0x3f2   : > { %2317 = vmatpush3.bf16.xpose.msra.mxu1 %v1602_v23  ;;  %2322 = vmatprep.mubr.msk.bf16.mxu1 %vm2704_vm4, %v2703_v48 }
 0x3f3   : > { %2318 = vmatprep.subr.bf16.mxu1 %v2703_v48 }
 0x3fa   : > { %2319 = vmatpush3.bf16.xpose.msra.mxu1 %v1605_v14 }
 0x3fb   : > { %2320 = vmatprep.subr.bf16.mxu1 %v2703_v48 }
 0x402   : > { %2321 = vmatpush3.bf16.xpose.msra.mxu1 %v1608_v36 }
 0x409   : > { %2323 = vmatmul.mubr.msk.bf16.vlgmr.msra.gmra.mrb[24].mxu1 %vm436_vm1, %v3092_v51  ;;  %v3211_v51 = vpop.permute.xlu1 %1652 }
 0x40d   : > { %v3213_v45 = vpop.permute.xlu1 %1656 }
 0x412   : > { %v1710_v37 = vpop.permute.xlu0 %1709 }
 0x413   : > { %v1712_v1 = vmul.f32 %v1710_v37, %v3086_v32  ;;  %v1713_v38 = vmul.f32 %v1710_v37, %v3080_v30  ;;  %v1714_v44 = vmul.f32 %v1710_v37, %v3083_v31 }
 0x415   : > { %v1718_v46 = vrot.slane %v1712_v1, 5  ;;  %v1719_v57 = vrot.slane %v1713_v38, 5  ;;  %v1721_v60 = vrot.slane %v1714_v44, 5  ;;  %v1528_v44 = vstv %s2367_s23  ;;  %s3332_s23 = scalar_lea.hbm %s3405_s10, %s2231_s16 }
 0x416   : > { %v1744_v0 = vpop.permute.xlu0 %1743 }
 0x417   : > { %v1720_v43 = vsel %vm1371_vm14, %v1718_v46, %v1719_v57  ;;  %v1722_v55 = vsel %vm1371_vm14, %v1719_v57, %v1721_v60  ;;  %v1530_v57 = vmul.f32 %v1528_v44, %v3028_v54  ;;  %v1536_v54 = vmul.f32 %v1528_v44, %v3067_v11 }
 0x418   : > { %1723 = vrot.lane.b32.xlu1 %v1720_v43, %s2705_s18  ;;  %v1748_v11 = vrot.slane %v1744_v0, 3 }
 0x41b   : > { %v1363_v2 = vpop.permute.xlu0 %1362 }
 0x41c   : > { %1725 = vrot.lane.b32.xlu1 %v1722_v55, %s2705_s18  ;;  %v1365_v10 = vmul.f32 %v1363_v2, %v3086_v32  ;;  %v1366_v56 = vmul.f32 %v1363_v2, %v3080_v30  ;;  %v1367_v17 = vmul.f32 %v1363_v2, %v3083_v31  ;;  %v1533_v55 = vmul.f32 %v1528_v44, %v3052_v5 }
 0x41d   : > { %v1534_v5 = vmul.f32 %v1528_v44, %v3059_v7 }
 0x41e   : > { %v1372_v21 = vrot.slane %v1365_v10, 5  ;;  %v1373_v15 = vrot.slane %v1366_v56, 5  ;;  %v1375_v24 = vrot.slane %v1367_v17, 5  ;;  %v1535_v17 = vmul.f32 %v1528_v44, %v3061_v8 }
 0x41f   : > { %v1754_v8 = vmul.f32 %v1748_v11, %v3086_v32 }
 0x420   : > { %1746 = vperm.xlu1 %2466, %v3113_v39   ;;  %v1374_v27 = vsel %vm1371_vm14, %v1372_v21, %v1373_v15  ;;  %v1376_v1 = vsel %vm1371_vm14, %v1373_v15, %v1375_v24 }
 0x424   : > { %2468 = vset.pattern.permute.xlu1 %v2702_v12 }
 0x425   : > { %1284 = vperm.xlu1 %2468, %v3121_v16  }
 0x429   : > { %1289 = vperm.xlu1 %2468, %v3106_v6  }
 0x48a   : > { %v3217_v63 = vpop.permute.xlu1 %1723 }
 0x48e   : > { %v3221_v16 = vpop.permute.xlu1 %1725 }
 0x490   : > { %v1349_v53 = vpop.f32.mrb[12].mxu1 }
 0x491   : > { %v2302_v47 = vpop.f32.mrb[13].mxu1 }
 0x492   : > { %v1352_v62 = vpop.f32.mrb[14].mxu1  ;;  %v1531_v47 = vmul.f32 %v1528_v44, %v3030_v33  ;;  %v1537_v33 = vmul.f32 %v1528_v44, %v3069_v13 }
 0x493   : > { %v2303_v58 = vpop.f32.mrb[15].mxu1  ;;  %v3215_v40 = vpop.f32.mrb[8].mxu0 }
 0x494   : > { %v2330_v52 = vpop.f32.mrb[9].mxu0 }
 0x495   : > { %v3219_v39 = vpop.f32.mrb[10].mxu0 }
 0x496   : > { %v2331_v12 = vpop.f32.mrb[11].mxu0 }
 0x49f   : > { %v1747_v9 = vpop.permute.xlu1 %1746 }
 0x4a0   : > { %v1749_v7 = vrot.slane %v1747_v9, 3 }
 0x4a4   : > { %v1285_v42 = vpop.permute.xlu1 %1284 }
 0x4a5   : > { %v1292_v22 = vmul.f32 %v1285_v42, %v3127_v19  ;;  %v1532_v19 = vmul.f32 %v1528_v44, %v3050_v4 }
 0x4a7   : > { %v1350_v23 = vadd.f32 %v1349_v53, %v1292_v22  ;;  %v1750_v22 = vsel %vm821_vm7, %v1748_v11, %v1749_v7 }
 0x4a8   : > { %v1290_v14 = vpop.permute.xlu1 %1289  ;;  %v1755_v13 = vmul.f32 %v1750_v22, %v3080_v30 }
 0x4a9   : > { %v1379_v35 = vadd.f32 %v1374_v27, %v1350_v23  ;;  %v1293_v36 = vmul.f32 %v1290_v14, %v3131_v29  ;;  %v1756_v23 = vmul.f32 %v1749_v7, %v3083_v31  ;;  %v2494_v7 = vld [vmem:[%s3404_s9] sm:$0xff]  }
 0x4aa   : > { %v1757_v24 = vpack.c.bf16 %v1755_v13, %v1754_v8 }
 0x4ab   : > { %1381 = vst.msk [vmem:[#allocation4] sm:$0xff] %vm436_vm1, %v1379_v35  ;;  %v1353_v37 = vadd.f32 %v1352_v62, %v1293_v36  ;;  %v1758_v27 = vpack.c.bf16 %v1756_v23, %v1756_v23  ;;  %v2496_v23 = vld [vmem:[%s3404_s9 + $0x10] sm:$0xff]  }
 0x4ac   : > { %v1760_v36 = vshrl.u32 %v1757_v24, 16 }
 0x4ad   : > { %v1380_v38 = vadd.f32 %v1376_v1, %v1353_v37  ;;  %v1768_v14 = vshrl.u32 %v1758_v27, 16  ;;  %v1771_v35 = vshll.u32 %v1758_v27, 16  ;;  %v1763_v37 = vshll.u32 %v1757_v24, 16  ;;  %v2497_v27 = vld [vmem:[%s3404_s9 + $0x18] sm:$0xff]  }
 0x4af   : > { %1382 = vst.msk [vmem:[#allocation4 + $0x8] sm:$0xff] %vm436_vm1, %v1380_v38  ;;  %v1770_v9 = vrot.slane %v1768_v14, 2  ;;  %v1773_v0 = vrot.slane %v1771_v35, 3  ;;  %v2498_v14 = vld [vmem:[%s3404_s9 + $0x20] sm:$0xff]   ;;  %v2499_v35 = vld [vmem:[%s3404_s9 + $0x28] sm:$0xff]  }
 0x4bc   : > { %v2308_v46 = vpop.f32.mrb[16].mxu1 }
 0x4bd   : > { %v1540_v60 = vadd.f32 %v2308_v46, %v1532_v19  ;;  %v1495_v43 = vpop.f32.mrb[17].mxu1  ;;  %v1762_v46 = vrot.slane %v1760_v36, 2 }
 0x4be   : > { %v1538_v29 = vadd.f32 %v1530_v57, %v1495_v43  ;;  %v2309_v53 = vpop.f32.mrb[18].mxu1  ;;  %v1765_v57 = vrot.slane %v1763_v37, 3 }
 0x4bf   : > { %1548 = vst.msk [vmem:[#allocation2 + $0x10] sm:$0xff] %vm436_vm1, %v1540_v60  ;;  %v1541_v62 = vadd.f32 %v2309_v53, %v1533_v55  ;;  %v1498_v58 = vpop.f32.mrb[19].mxu1 }
 0x4c0   : > { %1546 = vst.msk [vmem:[#allocation2] sm:$0xff] %vm436_vm1, %v1538_v29  ;;  %v1539_v52 = vadd.f32 %v1531_v47, %v1498_v58  ;;  %v1766_v55 = vor.u32 %v1765_v57, %v1762_v46  ;;  %v1774_v29 = vor.u32 %v1773_v0, %v1770_v9  ;;  %v2501_v9 = vld [vmem:[%s3404_s9 + $0x38] sm:$0xff]   ;;  %v2219_v0 = vld [vmem:[%s3403_s8] ss:$0 sm:$0xff] }
 0x4c1   : > { %1549 = vst.msk [vmem:[#allocation2 + $0x18] sm:$0xff] %vm436_vm1, %v1541_v62 }
 0x4c2   : > { %1547 = vst.msk [vmem:[#allocation2 + $0x8] sm:$0xff] %vm436_vm1, %v1539_v52  ;;  %v1775_v53 = vsel %vm1111_vm13, %v1766_v55, %v1774_v29 }
 0x4c4   : > { %v2312_v4 = vpop.f32.mrb[20].mxu1 }
 0x4c5   : > { %v1544_v12 = vadd.f32 %v2312_v4, %v1536_v54  ;;  %v1511_v2 = vpop.f32.mrb[21].mxu1 }
 0x4c6   : > { %v1542_v10 = vadd.f32 %v1534_v5, %v1511_v2  ;;  %v2313_v56 = vpop.f32.mrb[22].mxu1 }
 0x4c7   : > { %1552 = vst.msk [vmem:[#allocation2 + $0x30] sm:$0xff] %vm436_vm1, %v1544_v12  ;;  %v1545_v21 = vadd.f32 %v2313_v56, %v1537_v33  ;;  %v1514_v15 = vpop.f32.mrb[23].mxu1 }
 0x4c8   : > { %1550 = vst.msk [vmem:[#allocation2 + $0x20] sm:$0xff] %vm436_vm1, %v1542_v10  ;;  %v1543_v42 = vadd.f32 %v1535_v17, %v1514_v15 }
 0x4c9   : > { %1553 = vst.msk [vmem:[#allocation2 + $0x38] sm:$0xff] %vm436_vm1, %v1545_v21 }
 0x4ca   : > { %1551 = vst.msk [vmem:[#allocation2 + $0x28] sm:$0xff] %vm436_vm1, %v1543_v42 }
 0x4dc   : > { %v1644_v1 = vpop.f32.mrb[24].mxu1 }
 0x4dd   : > { %v1659_v38 = vmul.f32 %v3211_v51, %v1644_v1  ;;  %v2324_v44 = vpop.f32.mrb[25].mxu1  ;;  %v2500_v1 = vld [vmem:[%s3404_s9 + $0x30] sm:$0xff]  }
 0x4de   : > { %v1647_v19 = vpop.f32.mrb[26].mxu1 }
 0x4df   : > { %v1702_v30 = vadd.f32 %v3215_v40, %v1659_v38  ;;  %v1660_v31 = vmul.f32 %v3213_v45, %v1647_v19  ;;  %v2325_v32 = vpop.f32.mrb[27].mxu1  ;;  %v2217_v40 = vmul.f32 -1.442695, %v2965_v59  ;;  %v2218_v45 = vmul.f32 -1.442695, %v2974_v3 }
 0x4e1   : > { %v1705_v60 = vadd.f32 %v3219_v39, %v1660_v31  ;;  %v1729_v43 = vadd.f32 %v3217_v63, %v1702_v30  ;;  %2556 = vpow2.f32 %v2217_v40 }
 0x4e2   : > { %2558 = vpow2.f32 %v2218_v45 }
 0x4e3   : > { %1733 = vrot.lane.b32.xlu0 %v1729_v43, %s2705_s18  ;;  %v1730_v51 = vadd.f32 %v3221_v16, %v1705_v60 }
 0x4e5   : > { %1735 = vrot.lane.b32.xlu1 %v1730_v51, %s2705_s18 }
 0x4e7   : > { %1776 = vrot.lane.b32.xlu0 %v1775_v53, %s2705_s18  ;;  %s2067_s18 = sshll.u32 %s2890_s30, 4  ;;  %s3334_s18 = int_to_ptr.vmem [resolvable:$true] %s2067_s18 }
 0x4e8   : > { %s2598_s26 = scalar_lea.vmem %s3334_s18, 256 }
 0x4e9   : > { %p2599_p12 = scmp.ne.s32.totalorder %s3334_s18, %s2598_s26 }
 0x4eb   : > { %v2557_v39 = vpop.eup %2556  ;;  %p2600_p2 = pnand %p2599_p12, %p3426_p0 }
 0x4ec   : > { %v2559_v63 = vpop.eup %2558  ;;  %v1909_v47 = vadd.f32 1.0, %v2557_v39 }
 0x4ed   : > { %v1910_v62 = vadd.f32 1.0, %v2559_v63  ;;  %p2601_p5 = pneg %p2600_p2 }
 0x4ee   : > { %2560 = vrcp.f32 %v1909_v47 }
 0x4ef   : > { %2562 = vrcp.f32 %v1910_v62 }
 0x4f8   : > { %v2561_v52 = vpop.eup %2560 }
 0x4f9   : > { %v2563_v54 = vpop.eup %2562  ;;  %v1915_v4 = vmul.f32 %v2561_v52, %v2965_v59 }
 0x4fa   : > { %v1916_v12 = vmul.f32 %v2563_v54, %v2974_v3 }
 0x555   : > { %v1734_v16 = vpop.permute.xlu0 %1733 }
 0x556   : > { %1740 = vst.msk [vmem:[#allocation4] sm:$0xff] %vm1739_vm15, %v1734_v16 }
 0x557   : > { %v1736_v58 = vpop.permute.xlu1 %1735 }
 0x558   : > { %1741 = vst.msk [vmem:[#allocation4 + $0x8] sm:$0xff] %vm1739_vm15, %v1736_v58 }
 0x559   : > { %v1777_v21 = vpop.permute.xlu0 %1776 }
 0x55d   : > { %v1901_v5 = vld [vmem:[#allocation4] sm:$0xff] }
 0x55e   : > { %v1917_v2 = vmul.f32 %v1915_v4, %v1901_v5 }
 0x55f   : > { %v1902_v33 = vld [vmem:[#allocation4 + $0x8] sm:$0xff] }
 0x560   : > { %v1919_v10 = vmul.f32 %v1917_v2, %v1917_v2  ;;  %v1918_v56 = vmul.f32 %v1916_v12, %v1902_v33  ;;  %v2569_v12 = vld [vmem:[%s2888_s29 + $0x8] sm:$0xff] }
 0x562   : > { %1921 = vadd.xlane.f32.xlu1 %v1919_v10  ;;  %v1920_v17 = vmul.f32 %v1918_v56, %v1918_v56 }
 0x564   : > { %1923 = vadd.xlane.f32.xlu0 %v1920_v17 }
 0x573   : > { %1872 = vrot.lane.b32.xlu1 %v1526_v41, %s2707_s25  ;;  %v2495_v41 = vld [vmem:[%s3404_s9 + $0x8] sm:$0xff]   ;;  %s2708_s25 = smov [#allocation8]  }
 0x591   : > { %1779 = vxpose.xlu0.c.b16.start.end [1/1] (short) (narrow) %v1777_v21, 64 }
 0x59a   : > { %2469 = vset.pattern.permute.xlu0 %v2706_v18 }
 0x5ef   : > { %v1922_v15 = vpop.xlane.xlu1 %1921 }
 0x5f0   : > { %v1926_v18 = vmul.f32 0.0078125, %v1922_v15 }
 0x5f1   : > { %v1924_v59 = vpop.xlane.xlu0 %1923 }
 0x5f2   : > { %v1927_v6 = vmul.f32 0.0078125, %v1924_v59  ;;  %v1928_v8 = vadd.f32 1e-05, %v1926_v18 }
 0x5f3   : > { %v1873_v42 = vpop.permute.xlu1 %1872 }
 0x5f4   : > { %2368 = vpush %v1873_v42  ;;  %v1929_v13 = vadd.f32 1e-05, %v1927_v6 }
 0x5f6   : > { %2564 = vrsqrt.f32 %v1929_v13 }
 0x5f7   : > { %v1787_v3 = vpop.trf.xlu0  ;;  %2566 = vrsqrt.f32 %v1928_v8 }
 0x5f8   : > { %2334 = vmatprep.mubr.msk.bf16.mxu0 %vm962_vm3, %v1787_v3 }
 0x5fb   : > { %v1788_v11 = vpop.trf.xlu0 }
 0x5fc   : > { %2335 = vmatmul.mubr.msk.bf16.vlgmr.msra.gmra.mrb[12].mxu0 %vm962_vm3, %v1788_v11 }
 0x5fd   : > { %2343 = vmatpush3.bf16.msra.mxu0 %v2494_v7 }
 0x5fe   : > { %2344 = vmatprep.subr.bf16.mxu0 %v2703_v48 }
 0x5ff   : > { %v1789_v22 = vpop.trf.xlu0 }
 0x600   : > { %2338 = vmatprep.mubr.msk.bf16.mxu0 %vm962_vm3, %v1789_v22  ;;  %v2565_v36 = vpop.eup %2564 }
 0x601   : > { %2345 = vmatpush3.bf16.msra.mxu0 %v2495_v41  ;;  %v2567_v37 = vpop.eup %2566  ;;  %v1933_v38 = vmul.f32 %v2565_v36, %v1918_v56 }
 0x602   : > { %2346 = vmatprep.subr.bf16.mxu0 %v2703_v48  ;;  %v1932_v44 = vmul.f32 %v2567_v37, %v1917_v2 }
 0x603   : > { %v1790_v24 = vpop.trf.xlu0  ;;  %v1942_v19 = vmul.f32 %v2219_v0, %v1933_v38 }
 0x604   : > { %2339 = vmatmul.mubr.msk.bf16.gmra.mrb[16].mxu0 %vm962_vm3, %v1790_v24  ;;  %v1941_v46 = vmul.f32 %v2219_v0, %v1932_v44 }
 0x605   : > { %2347 = vmatpush3.bf16.msra.mxu0 %v2496_v23  ;;  %2358 = vmatprep.mubr.msk.bf16.mxu0 %vm2704_vm4, %v2703_v48 }
 0x606   : > { %2348 = vmatprep.subr.bf16.mxu0 %v2703_v48  ;;  %v1943_v57 = vpack.c.bf16 %v1942_v19, %v1941_v46 }
 0x609   : > { %2349 = vmatpush3.bf16.msra.mxu0 %v2497_v27 }
 0x60a   : > { %2350 = vmatprep.subr.bf16.mxu0 %v2703_v48 }
 0x60d   : > { %2351 = vmatpush3.bf16.msra.mxu0 %v2498_v14 }
 0x60e   : > { %2352 = vmatprep.subr.bf16.mxu0 %v2703_v48 }
 0x611   : > { %2353 = vmatpush3.bf16.msra.mxu0 %v2499_v35 }
 0x612   : > { %2354 = vmatprep.subr.bf16.mxu0 %v2703_v48 }
 0x615   : > { %2355 = vmatpush3.bf16.msra.mxu0 %v2500_v1 }
 0x616   : > { %2356 = vmatprep.subr.bf16.mxu0 %v2703_v48 }
 0x619   : > { %2357 = vmatpush3.bf16.msra.mxu0 %v2501_v9 }
 0x61c   : > { %2359 = vmatmul.mubr.bf16.vlgmr.msra.gmra.mrb[20].mxu0 %v1943_v57 }
 0x625   : > { %s2369_s12 = spop %2368 }
 0x626   : > { %v1875_v30 = vstv %s2369_s12  ;;  %s2602_s12 = sshll.u32 %s2708_s25, 4  ;;  %s2603_s12 = int_to_ptr.vmem [resolvable:$false] %s2602_s12 }
 0x627   : > { %v1879_v31 = vmul.f32 %v1875_v30, %v3169_v20  ;;  %v1877_v60 = vmul.f32 %v1875_v30, %v3161_v49  ;;  %v1880_v29 = vmul.f32 %v1875_v30, %v3171_v25  ;;  %v1878_v48 = vmul.f32 %v1875_v30, %v3163_v50  ;;  %s2604_s19 = scalar_lea.vmem %s2603_s12, 512  ;;  %p2605_p6 = scmp.lt.s32.totalorder %s3334_s18, %s2603_s12 }
 0x628   : > { %v1883_v49 = vmul.f32 %v1875_v30, %v3190_v28  ;;  %v1881_v25 = vmul.f32 %v1875_v30, %v3179_v26  ;;  %v1884_v47 = vmul.f32 %v1875_v30, %v3192_v34  ;;  %v1882_v58 = vmul.f32 %v1875_v30, %v3181_v61  ;;  %v2568_v61 = vld [vmem:[%s2888_s29] sm:$0xff]  ;;  %p2606_p7 = scmp.lt.s32.totalorder %s2604_s19, %s2598_s26 }
 0x62a   : > { %p2607_p9 = por %p2606_p7, %p2605_p6 }
 0x62c   : > { %p2608_p11 = pnand %p2607_p9, %p2601_p5 }
 0x6cf   : > { %v2336_v32 = vpop.f32.mrb[12].mxu0 }
 0x6d0   : > { %v1887_v43 = vadd.f32 %v2336_v32, %v1879_v31  ;;  %v1841_v55 = vpop.f32.mrb[13].mxu0 }
 0x6d1   : > { %v1885_v51 = vadd.f32 %v1877_v60, %v1841_v55  ;;  %v2337_v53 = vpop.f32.mrb[14].mxu0 }
 0x6d2   : > { %1895 = vst.msk [vmem:[#allocation2 + $0x50] sm:$0xff] %vm436_vm1, %v1887_v43  ;;  %v1888_v40 = vadd.f32 %v2337_v53, %v1880_v29  ;;  %v1844_v45 = vpop.f32.mrb[15].mxu0 }
 0x6d3   : > { %1893 = vst.msk [vmem:[#allocation2 + $0x40] sm:$0xff] %vm436_vm1, %v1885_v51  ;;  %v1886_v39 = vadd.f32 %v1878_v48, %v1844_v45 }
 0x6d4   : > { %1896 = vst.msk [vmem:[#allocation2 + $0x58] sm:$0xff] %vm436_vm1, %v1888_v40 }
 0x6d5   : > { %1894 = vst.msk [vmem:[#allocation2 + $0x48] sm:$0xff] %vm436_vm1, %v1886_v39 }
 0x6d7   : > { %v2340_v20 = vpop.f32.mrb[16].mxu0 }
 0x6d8   : > { %v1891_v63 = vadd.f32 %v2340_v20, %v1883_v49  ;;  %v1857_v50 = vpop.f32.mrb[17].mxu0 }
 0x6d9   : > { %v1889_v62 = vadd.f32 %v1881_v25, %v1857_v50  ;;  %v2341_v16 = vpop.f32.mrb[18].mxu0 }
 0x6da   : > { %1899 = vst.msk [vmem:[#allocation2 + $0x70] sm:$0xff] %vm436_vm1, %v1891_v63  ;;  %v1892_v52 = vadd.f32 %v2341_v16, %v1884_v47  ;;  %v1860_v54 = vpop.f32.mrb[19].mxu0 }
 0x6db   : > { %1897 = vst.msk [vmem:[#allocation2 + $0x60] sm:$0xff] %vm436_vm1, %v1889_v62  ;;  %v1890_v28 = vadd.f32 %v1882_v58, %v1860_v54 }
 0x6dc   : > { %1900 = vst.msk [vmem:[#allocation2 + $0x78] sm:$0xff] %vm436_vm1, %v1892_v52 }
 0x6dd   : > { %1898 = vst.msk [vmem:[#allocation2 + $0x68] sm:$0xff] %vm436_vm1, %v1890_v28 }
 0x6ef   : > { %v2042_v26 = vpop.f32.mrb[20].mxu0 }
 0x6f0   : > { %v2043_v34 = vadd.f32 %v2568_v61, %v2042_v26  ;;  %v2360_v4 = vpop.f32.mrb[21].mxu0 }
 0x6f1   : > { %v2045_v5 = vpop.f32.mrb[22].mxu0 }
 0x6f2   : > { %2049 = vst.msk [vmem:[%s2890_s30] sm:$0xff] %vm436_vm1, %v2043_v34  ;;  %v2046_v2 = vadd.f32 %v2569_v12, %v2045_v5  ;;  %v2361_v33 = vpop.f32.mrb[23].mxu0 }
 0x6f4   : > { %2050 = vst.msk [vmem:[%s2890_s30 + $0x8] sm:$0xff] %vm436_vm1, %v2046_v2 }
 0x6f5   : > { %2611 = shalt.err (!%p2608_p11)
}
 0x6f6   : > { %s2612_s22 = scalar_lea.hbm %s3332_s23, 256  ;;  %s2616_s24 = scalar_lea.hbm %s3405_s10, 1024 }
 0x6f7   : > { %p2613_p13 = scmp.ne.s32.totalorder %s3332_s23, %s2612_s22  ;;  %p2617_p3 = scmp.lt.u32.totalorder %s3332_s23, %s3405_s10 }
 0x6f8   : > { %p2618_p8 = scmp.lt.u32.totalorder %s2616_s24, %s2612_s22  ;;  %p2620_p12 = scmp.lt.u32.totalorder %s2612_s22, %s3332_s23 }
 0x6f9   : > { %p2614_p1 = pnand %p2613_p13, %p3426_p0 }
 0x6fa   : > { %p2619_p10 = por %p2618_p8, %p2617_p3 }
 0x6fb   : > { %p2615_p4 = pneg %p2614_p1 }
 0x6fc   : > { %p2621_p2 = por %p2620_p12, %p2619_p10 }
 0x6fe   : > { %p2622_p5 = pnand %p2621_p2, %p2615_p4 }
 0x700   : > { %2625 = shalt.err (!%p2622_p5)
}
 0x701   : > { %s2709_s21 = smov 128   ;;  %s2710_s26 = smov 8  }
 0x702   : > { %2374 = dma.vmem_to_hbm [thread:$0]  (%p3426_p0), %s3334_s18, 256, %s3332_s23, %s3343_s17, %s2709_s21, %s2709_s21, %s2710_s26  }
 0x703 PF: > { %p2386_p6 = scmp.ge.s32.totalorder %s2696_s20, 2  ;;  %s2082_s25 = sand.u32 1, %s2668_s13  }
 0x704   : > { %p3427_p7 = scmp.ne.s32.totalorder %s3419_s28, 0  ;;  %s2083_s12 = scalar_lea.sflag [#allocation7], %s2082_s25 }
 0x706   : > { %p2381_p9 = pnand %p2386_p6, %p3427_p7 }
 0x708   : > { %2663 = dma.done.wait (!%p2381_p9), %s2083_s12, 256  }
 0x709   : > { %2665 = vsyncadd (!%p2381_p9), %s2083_s12, 4294967040  ;;  %s24_s20 = sadd.s32 1, %s2696_s20   ;;  %s3428_s19 = sld [smem:[#allocation15_spill]] }
 0x70a   : > { %p21_p11 = scmp.ge.s32.totalorder %s24_s20, 6   ;;  %s3429_s16 = sld [smem:[#allocation11_spill]] }
 0x70b   : > { %s3430_s17 = sld [smem:[#allocation12_spill]]  ;;  %s3431_s18 = sld [smem:[#allocation13_spill]] }
 0x70c   : > { %s3432_s27 = sld [smem:[#allocation14_spill]]  ;;  %s3433_s13 = smov %s2672_s14 }
 0x70d   : > { %s3434_s14 = smov %s2676_s15  ;;  %23 = sbr.rel (!%p21_p11) target bundleno = 6 (0x6), region = 105 }
 0x70f   : > { %s3435_s15 = smov %s3428_s19 }
 0x712   : > { %s3436_s19 = smov %s3432_s27 }
 0x714   :  { %2088 = vsyncpa [#allocation6], 1 }
 0x715   :  { %2090 = vsyncpa [#allocation6 + $0x1], 1 }
 0x716   :  { %2091 = vsyncpa [#allocation7], 1 }
 0x717   :  { %2093 = vsyncpa [#allocation7 + $0x1], 1 }

</bundles_post_ra>
